<compile_context>
chip_gen: v7x
topology: tpu7x:2x2x1
jax: 0.10.0
libtpu: 0.0.40
codegen_flags: <defaults>
</compile_context>

<pallas_src>
import functools

import jax
import jax.numpy as jnp
from jax.experimental import pallas as pl
from jax.experimental.pallas import tpu as pltpu


def _round_up(x, m):
    return ((x + m - 1) // m) * m


def _gcmc_conv_kernel(num_r, deg_col,
                      a_ref, h_src_ref, h_dst_ref,
                      wrT_ref, w_dst_ref, w_neigh_ref, b_ref,
                      out_ref, acc_ref):
    """One GCMCConv relation, tiled over (dst, src).

    a_ref:      (num_r, t_dst, t_src) bf16  per-rating adjacency tile
    h_src_ref:  (t_src, d_pad)        bf16  src features (col `deg_col` == 1.0)
    h_dst_ref:  (t_dst, d_pad)        bf16  dst features
    wrT_ref:    (num_r, d_pad, d_pad) bf16  W_r^T, zero-padded
    w_dst_ref:  (d_pad, d_pad)        bf16  Linear slice for h_dst (pre-T, padded)
    w_neigh_ref:(d_pad, d_pad)        bf16  Linear slice for h_neigh (pre-T, padded)
    b_ref:      (1, d_pad)            f32   Linear bias (padded)
    out_ref:    (t_dst, d_pad)        f32
    acc_ref:    (num_r, t_dst, d_pad) f32   per-rating accumulator scratch
    """
    s = pl.program_id(1)

    @pl.when(s == 0)
    def _init():
        acc_ref[...] = jnp.zeros_like(acc_ref)

    # Reduction over src tiles: acc_r += A[r] @ h_src  (bf16 MXU, f32 accumulate).
    # The ones-column of h_src makes acc_r[:, deg_col] the per-rating in-degree.
    h_src = h_src_ref[...]
    for r in range(num_r):                   # num_r is small & static -> unrolled
        acc_ref[r] += jnp.dot(a_ref[r], h_src, preferred_element_type=jnp.float32)

    @pl.when(s == pl.num_programs(1) - 1)
    def _finalize():
        # Per-rating reads: never materialize the full (num_r, t_dst, 128) f32
        # accumulator at once (keeps the epilogue within the vreg budget).
        acc_0 = acc_ref[0]
        deg = acc_0[:, deg_col:deg_col + 1]
        neigh = jnp.dot(acc_0.astype(jnp.bfloat16), wrT_ref[0],
                        preferred_element_type=jnp.float32)
        for r in range(1, num_r):
            acc_r = acc_ref[r]
            deg = deg + acc_r[:, deg_col:deg_col + 1]
            neigh = neigh + jnp.dot(acc_r.astype(jnp.bfloat16), wrT_ref[r],
                                    preferred_element_type=jnp.float32)

        # total in-degree over all ratings (exact integers in f32)
        inv_deg = jnp.where(deg > 0.5, 1.0 / jnp.maximum(deg, 1.0), 0.0)
        # zero-padded rows/cols of W_r^T keep the degree column out of h_neigh
        neigh = (neigh * inv_deg).astype(jnp.bfloat16)

        # relu(Linear(concat([h_dst, h_neigh]))) as a split bf16 matmul
        lin = (jnp.dot(h_dst_ref[...], w_dst_ref[...],
                       preferred_element_type=jnp.float32)
               + jnp.dot(neigh, w_neigh_ref[...],
                         preferred_element_type=jnp.float32)
               + b_ref[...])
        out_ref[...] = jnp.maximum(lin, 0.0).astype(out_ref.dtype)


def make_gcmc_conv(adj, w_r, w_lin, b_lin, *, t_dst_max=512, t_src_max=2048):
    """Builds the Pallas conv for one relation.

    The graph/weight packing (pad + cast + transpose) happens ONCE here, outside
    the per-forward hot path.  Returns conv(h_src, h_dst) -> (n_dst, d).

    adj:   (num_r, n_dst, n_src) dense 0/1 per-rating adjacency
    w_r:   (num_r, d, d)   (torch convention: message = W_r @ h_src)
    w_lin: (d, 2d), b_lin: (d,)   (torch Linear: y = x @ W.T + b)
    """
    num_r, n_dst, n_src = adj.shape
    d = w_lin.shape[0]
    d_pad = _round_up(d + 1, 128)          # +1 lane for the in-degree "ones" column
    deg_col = d

    # tile sizes: dst multiple of 16 (bf16 sublane pack), src multiple of 128 (lane)
    t_dst = min(t_dst_max, _round_up(n_dst, 16))
    t_src = min(t_src_max, _round_up(n_src, 128))
    n_dst_pad = _round_up(n_dst, t_dst)
    n_src_pad = _round_up(n_src, t_src)
    grid = (n_dst_pad // t_dst, n_src_pad // t_src)

    # --- one-time packing (all padding is zero, so it never contributes) ---
    adj_p = jnp.zeros((num_r, n_dst_pad, n_src_pad), jnp.bfloat16)
    adj_p = adj_p.at[:, :n_dst, :n_src].set(adj.astype(jnp.bfloat16))       # exact

    wrT_p = jnp.zeros((num_r, d_pad, d_pad), jnp.bfloat16)
    wrT_p = wrT_p.at[:, :d, :d].set(
        jnp.transpose(w_r, (0, 2, 1)).astype(jnp.bfloat16))                 # pre-T

    w_dst_p = jnp.zeros((d_pad, d_pad), jnp.bfloat16)
    w_dst_p = w_dst_p.at[:d, :d].set(w_lin[:, :d].T.astype(jnp.bfloat16))
    w_neigh_p = jnp.zeros((d_pad, d_pad), jnp.bfloat16)
    w_neigh_p = w_neigh_p.at[:d, :d].set(w_lin[:, d:].T.astype(jnp.bfloat16))
    b_p = jnp.zeros((1, d_pad), jnp.float32).at[0, :d].set(
        b_lin.astype(jnp.float32))

    # --- VMEM budget derived from the actual working set (review item) ---
    buf_bytes = (num_r * t_dst * t_src * 2     # adjacency tile (bf16)
                 + t_src * d_pad * 2           # h_src tile (bf16)
                 + t_dst * d_pad * 2           # h_dst tile (bf16)
                 + num_r * d_pad * d_pad * 2   # W_r^T (bf16, same block each step)
                 + 2 * d_pad * d_pad * 2       # Linear halves (bf16)
                 + 8 * d_pad * 4               # bias (sublane-padded)
                 + t_dst * d_pad * 4)          # out tile (f32)
    working_set = 2 * buf_bytes + num_r * t_dst * d_pad * 4   # x2 pipeline bufs + acc
    vmem_limit = min(int(working_set * 1.25) + (4 << 20), 60 << 20)

    flops = int(2 * num_r * n_dst_pad * n_src_pad * d_pad
                + grid[0] * 2 * (num_r + 2) * t_dst * d_pad * d_pad)
    bytes_accessed = int(adj_p.size * 2
                         + grid[0] * n_src_pad * d_pad * 2     # h_src re-streamed per dst tile
                         + n_dst_pad * d_pad * 2               # h_dst
                         + wrT_p.size * 2 + 2 * d_pad * d_pad * 2 + d_pad * 4
                         + n_dst_pad * d_pad * 4)              # out

    kernel = functools.partial(_gcmc_conv_kernel, num_r, deg_col)
    conv_call = pl.pallas_call(
        kernel,
        out_shape=jax.ShapeDtypeStruct((n_dst_pad, d_pad), jnp.float32),
        grid_spec=pltpu.PrefetchScalarGridSpec(
            num_scalar_prefetch=0,
            grid=grid,
            in_specs=[
                pl.BlockSpec((num_r, t_dst, t_src), lambda i, s: (0, i, s)),
                # h_src: streamed per src tile (re-DMA'd per dst tile is only a
                # few % of HBM traffic once t_dst is large).
                pl.BlockSpec((t_src, d_pad), lambda i, s: (s, 0)),
                pl.BlockSpec((t_dst, d_pad), lambda i, s: (i, 0)),
                # resident weights: same block every step -> DMA'd once
                pl.BlockSpec((num_r, d_pad, d_pad), lambda i, s: (0, 0, 0)),
                pl.BlockSpec((d_pad, d_pad), lambda i, s: (0, 0)),
                pl.BlockSpec((d_pad, d_pad), lambda i, s: (0, 0)),
                pl.BlockSpec((1, d_pad), lambda i, s: (0, 0)),
            ],
            out_specs=pl.BlockSpec((t_dst, d_pad), lambda i, s: (i, 0)),
            scratch_shapes=[pltpu.VMEM((num_r, t_dst, d_pad), jnp.float32)],
        ),
        compiler_params=pltpu.CompilerParams(
            dimension_semantics=("parallel", "arbitrary"),
            vmem_limit_bytes=vmem_limit,
        ),
        cost_estimate=pl.CostEstimate(flops=flops, transcendentals=0,
                                      bytes_accessed=bytes_accessed),
    )

    def conv(h_src, h_dst):
        # per-call work is only the small (n x d) feature pad/cast
        h_src_p = jnp.zeros((n_src_pad, d_pad), jnp.bfloat16)
        h_src_p = h_src_p.at[:n_src, :d].set(h_src.astype(jnp.bfloat16))
        h_src_p = h_src_p.at[:n_src, deg_col].set(1.0)   # degree column (exact)
        h_dst_p = jnp.zeros((n_dst_pad, d_pad), jnp.bfloat16)
        h_dst_p = h_dst_p.at[:n_dst, :d].set(h_dst.astype(jnp.bfloat16))
        out_p = conv_call(adj_p, h_src_p, h_dst_p, wrT_p, w_dst_p, w_neigh_p, b_p)
        return out_p[:n_dst, :d]

    return conv


def make_gcmc_layer(adj_watched, adj_watchedby, params):
    """GCMCLayer forward builder.

    'watchedby': item -> user (dst = user);  'watched': user -> item (dst = item).
    HeteroGraphConv aggregate='sum' is the identity here (one relation per dst).
    """
    conv_user = make_gcmc_conv(adj_watchedby,
                               params['watchedby']['W_r'],
                               params['watchedby']['W_lin'],
                               params['watchedby']['b_lin'])
    conv_item = make_gcmc_conv(adj_watched,
                               params['watched']['W_r'],
                               params['watched']['W_lin'],
                               params['watched']['b_lin'])

    def layer(h_user, h_item):
        out_user = conv_user(h_item, h_user)
        out_item = conv_item(h_user, h_item)
        return out_user, out_item

    return layer


# ---------- plain-JAX reference (for correctness check) ----------
def _ref_conv(adj, h_src, h_dst, w_r, w_lin, b_lin):
    msg = jnp.einsum('rij,uj->rui', w_r, h_src)           # per-rating messages
    summed = jnp.einsum('rvu,rui->vi', adj, msg)          # sum over incoming edges
    deg = adj.sum(axis=(0, 2))[:, None]
    h_neigh = jnp.where(deg > 0.0, summed / jnp.maximum(deg, 1.0), 0.0)
    cat = jnp.concatenate([h_dst, h_neigh], axis=1)
    return jnp.maximum(cat @ w_lin.T + b_lin[None, :], 0.0)


def _init_conv_params(key, hidden, num_r):
    k1, k2, k3 = jax.random.split(key, 3)
    bound = 1.0 / (2.0 * hidden) ** 0.5
    return {
        'W_r': jax.random.normal(k1, (num_r, hidden, hidden), jnp.float32),
        'W_lin': jax.random.uniform(k2, (hidden, 2 * hidden), jnp.float32,
                                    -bound, bound),
        'b_lin': jax.random.uniform(k3, (hidden,), jnp.float32, -bound, bound),
    }


if __name__ == "__main__":
    hidden, num_ratings = 32, 5
    num_r = num_ratings + 1
    n_user, n_item = 8, 16

    key = jax.random.PRNGKey(0)
    ks = jax.random.split(key, 6)

    h_user = jax.random.normal(ks[0], (n_user, hidden), jnp.float32)
    h_item = jax.random.normal(ks[1], (n_item, hidden), jnp.float32)

    # synthetic bipartite graph: rating[u, i] in {0..num_ratings}, edge prob 0.5
    rating = jax.random.randint(ks[2], (n_user, n_item), 0, num_r)
    edge_mask = jax.random.bernoulli(ks[3], 0.5, (n_user, n_item))
    onehot = ((rating[None, :, :] == jnp.arange(num_r)[:, None, None])
              & edge_mask[None, :, :])                         # (num_r, n_user, n_item)
    adj_watched = onehot.transpose(0, 2, 1).astype(jnp.float32)   # user -> item: [r, item, user]
    adj_watchedby = onehot.astype(jnp.float32)                    # item -> user: [r, user, item]

    params = {
        'watchedby': _init_conv_params(ks[4], hidden, num_r),
        'watched': _init_conv_params(ks[5], hidden, num_r),
    }

    # packing happens once here; the jitted hot path only pads features + runs
    # the two Pallas kernels.
    layer = jax.jit(make_gcmc_layer(adj_watched, adj_watchedby, params))
    out_user, out_item = layer(h_user, h_item)
    out_user = jax.block_until_ready(out_user)
    out_item = jax.block_until_ready(out_item)

    # Reference: same math in f32 with inputs rounded through bf16 where the
    # kernel streams/stores them.  Remaining difference vs the kernel is the
    # in-kernel bf16 rounding of intermediate matmul operands -> mixed-precision
    # tolerance of 2e-2.
    def _bf(x):
        return x.astype(jnp.bfloat16).astype(jnp.float32)

    ref_user = _ref_conv(adj_watchedby, _bf(h_item), _bf(h_user),
                         _bf(params['watchedby']['W_r']),
                         _bf(params['watchedby']['W_lin']),
                         params['watchedby']['b_lin'])
    ref_item = _ref_conv(adj_watched, _bf(h_user), _bf(h_item),
                         _bf(params['watched']['W_r']),
                         _bf(params['watched']['W_lin']),
                         params['watched']['b_lin'])

    assert out_user.shape == (n_user, hidden) and out_item.shape == (n_item, hidden)
    assert jnp.allclose(out_user, ref_user, rtol=2e-2, atol=2e-2)
    assert jnp.allclose(out_item, ref_item, rtol=2e-2, atol=2e-2)
    print("KERNEL_OK")
</pallas_src>

<mosaic_0001>
module attributes {stable_mosaic.version = 11 : i64} {
  func.func @_gcmc_conv_kernel(%arg0: i32, %arg1: i32, %arg2: memref<6x16x128xbf16, #tpu.memory_space<vmem>>, %arg3: memref<128x128xbf16, #tpu.memory_space<vmem>>, %arg4: memref<16x128xbf16, #tpu.memory_space<vmem>>, %arg5: memref<6x128x128xbf16, #tpu.memory_space<vmem>>, %arg6: memref<128x128xbf16, #tpu.memory_space<vmem>>, %arg7: memref<128x128xbf16, #tpu.memory_space<vmem>>, %arg8: memref<1x128xf32, #tpu.memory_space<vmem>>, %arg9: memref<16x128xf32, #tpu.memory_space<vmem>>, %arg10: memref<6x16x128xf32, #tpu.memory_space<vmem>>) attributes {dimension_semantics = [#tpu.dimension_semantics<parallel>, #tpu.dimension_semantics<arbitrary>], iteration_bounds = array<i64: 1, 1>, scalar_prefetch = 0 : i64, scratch_operands = 1 : i64, tpu.core_type = #tpu.core_type<tc>, window_params = [{transform_indices = @transform_0, window_bounds = array<i64: 6, 16, 128>}, {transform_indices = @transform_1, window_bounds = array<i64: 128, 128>}, {transform_indices = @transform_2, window_bounds = array<i64: 16, 128>}, {pipeline_mode = #tpu.pipeline_mode<synchronous>, transform_indices = @transform_3, window_bounds = array<i64: 6, 128, 128>}, {pipeline_mode = #tpu.pipeline_mode<synchronous>, transform_indices = @transform_4, window_bounds = array<i64: 128, 128>}, {pipeline_mode = #tpu.pipeline_mode<synchronous>, transform_indices = @transform_5, window_bounds = array<i64: 128, 128>}, {pipeline_mode = #tpu.pipeline_mode<synchronous>, transform_indices = @transform_6, window_bounds = array<i64: 1, 128>}, {transform_indices = @transform_7, window_bounds = array<i64: 16, 128>}]} {
    %c0_i32 = arith.constant 0 : i32
    %0 = arith.cmpi eq, %arg1, %c0_i32 : i32
    %1 = arith.extui %0 : i1 to i32
    %c0_i32_0 = arith.constant 0 : i32
    %2 = arith.cmpi ne, %1, %c0_i32_0 : i32
    scf.if %2 {
      %cst_58 = arith.constant 0.000000e+00 : f32
      %61 = vector.broadcast %cst_58 : f32 to vector<6x16x128xf32>
      %c0_59 = arith.constant 0 : index
      %c0_60 = arith.constant 0 : index
      %c0_61 = arith.constant 0 : index
      %62 = vector.load %arg10[%c0_59, %c0_60, %c0_61] : memref<6x16x128xf32, #tpu.memory_space<vmem>>, vector<6x16x128xf32>
      tpu.vector_store %arg10[%c0_59, %c0_60, %c0_61], %61 {strides = array<i32>} : memref<6x16x128xf32, #tpu.memory_space<vmem>>, vector<6x16x128xf32>,
    } else {
    }
    %c0 = arith.constant 0 : index
    %c0_1 = arith.constant 0 : index
    %3 = vector.load %arg3[%c0, %c0_1] : memref<128x128xbf16, #tpu.memory_space<vmem>>, vector<128x128xbf16>
    %c0_2 = arith.constant 0 : index
    %c0_3 = arith.constant 0 : index
    %c0_4 = arith.constant 0 : index
    %4 = vector.load %arg10[%c0_2, %c0_3, %c0_4] : memref<6x16x128xf32, #tpu.memory_space<vmem>>, vector<1x16x128xf32>
    %5 = vector.shape_cast %4 : vector<1x16x128xf32> to vector<16x128xf32>
    %c0_5 = arith.constant 0 : index
    %c0_6 = arith.constant 0 : index
    %c0_7 = arith.constant 0 : index
    %6 = vector.load %arg2[%c0_5, %c0_6, %c0_7] : memref<6x16x128xbf16, #tpu.memory_space<vmem>>, vector<1x16x128xbf16>
    %7 = vector.shape_cast %6 : vector<1x16x128xbf16> to vector<16x128xbf16>
    %cst = arith.constant dense<0.000000e+00> : vector<16x128xf32>
    %8 = tpu.matmul %7, %3, %cst {dimension_numbers = #tpu.dot_dimension_numbers<[1], [0], [0], [1], [0, 0, 1, 1], [], []>} : vector<16x128xbf16>, vector<128x128xbf16>, vector<16x128xf32> -> vector<16x128xf32>
    %9 = arith.addf %5, %8 : vector<16x128xf32>
    %c0_8 = arith.constant 0 : index
    %c0_9 = arith.constant 0 : index
    %c0_10 = arith.constant 0 : index
    %10 = vector.load %arg10[%c0_8, %c0_9, %c0_10] : memref<6x16x128xf32, #tpu.memory_space<vmem>>, vector<1x16x128xf32>
    %11 = vector.shape_cast %10 : vector<1x16x128xf32> to vector<16x128xf32>
    %12 = vector.shape_cast %9 : vector<16x128xf32> to vector<1x16x128xf32>
    tpu.vector_store %arg10[%c0_8, %c0_9, %c0_10], %12 {strides = array<i32>} : memref<6x16x128xf32, #tpu.memory_space<vmem>>, vector<1x16x128xf32>,
    %c1 = arith.constant 1 : index
    %c0_11 = arith.constant 0 : index
    %c0_12 = arith.constant 0 : index
    %13 = vector.load %arg10[%c1, %c0_11, %c0_12] : memref<6x16x128xf32, #tpu.memory_space<vmem>>, vector<1x16x128xf32>
    %14 = vector.shape_cast %13 : vector<1x16x128xf32> to vector<16x128xf32>
    %c1_13 = arith.constant 1 : index
    %c0_14 = arith.constant 0 : index
    %c0_15 = arith.constant 0 : index
    %15 = vector.load %arg2[%c1_13, %c0_14, %c0_15] : memref<6x16x128xbf16, #tpu.memory_space<vmem>>, vector<1x16x128xbf16>
    %16 = vector.shape_cast %15 : vector<1x16x128xbf16> to vector<16x128xbf16>
    %cst_16 = arith.constant dense<0.000000e+00> : vector<16x128xf32>
    %17 = tpu.matmul %16, %3, %cst_16 {dimension_numbers = #tpu.dot_dimension_numbers<[1], [0], [0], [1], [0, 0, 1, 1], [], []>} : vector<16x128xbf16>, vector<128x128xbf16>, vector<16x128xf32> -> vector<16x128xf32>
    %18 = arith.addf %14, %17 : vector<16x128xf32>
    %c1_17 = arith.constant 1 : index
    %c0_18 = arith.constant 0 : index
    %c0_19 = arith.constant 0 : index
    %19 = vector.load %arg10[%c1_17, %c0_18, %c0_19] : memref<6x16x128xf32, #tpu.memory_space<vmem>>, vector<1x16x128xf32>
    %20 = vector.shape_cast %19 : vector<1x16x128xf32> to vector<16x128xf32>
    %21 = vector.shape_cast %18 : vector<16x128xf32> to vector<1x16x128xf32>
    tpu.vector_store %arg10[%c1_17, %c0_18, %c0_19], %21 {strides = array<i32>} : memref<6x16x128xf32, #tpu.memory_space<vmem>>, vector<1x16x128xf32>,
    %c2 = arith.constant 2 : index
    %c0_20 = arith.constant 0 : index
    %c0_21 = arith.constant 0 : index
    %22 = vector.load %arg10[%c2, %c0_20, %c0_21] : memref<6x16x128xf32, #tpu.memory_space<vmem>>, vector<1x16x128xf32>
    %23 = vector.shape_cast %22 : vector<1x16x128xf32> to vector<16x128xf32>
    %c2_22 = arith.constant 2 : index
    %c0_23 = arith.constant 0 : index
    %c0_24 = arith.constant 0 : index
    %24 = vector.load %arg2[%c2_22, %c0_23, %c0_24] : memref<6x16x128xbf16, #tpu.memory_space<vmem>>, vector<1x16x128xbf16>
    %25 = vector.shape_cast %24 : vector<1x16x128xbf16> to vector<16x128xbf16>
    %cst_25 = arith.constant dense<0.000000e+00> : vector<16x128xf32>
    %26 = tpu.matmul %25, %3, %cst_25 {dimension_numbers = #tpu.dot_dimension_numbers<[1], [0], [0], [1], [0, 0, 1, 1], [], []>} : vector<16x128xbf16>, vector<128x128xbf16>, vector<16x128xf32> -> vector<16x128xf32>
    %27 = arith.addf %23, %26 : vector<16x128xf32>
    %c2_26 = arith.constant 2 : index
    %c0_27 = arith.constant 0 : index
    %c0_28 = arith.constant 0 : index
    %28 = vector.load %arg10[%c2_26, %c0_27, %c0_28] : memref<6x16x128xf32, #tpu.memory_space<vmem>>, vector<1x16x128xf32>
    %29 = vector.shape_cast %28 : vector<1x16x128xf32> to vector<16x128xf32>
    %30 = vector.shape_cast %27 : vector<16x128xf32> to vector<1x16x128xf32>
    tpu.vector_store %arg10[%c2_26, %c0_27, %c0_28], %30 {strides = array<i32>} : memref<6x16x128xf32, #tpu.memory_space<vmem>>, vector<1x16x128xf32>,
    %c3 = arith.constant 3 : index
    %c0_29 = arith.constant 0 : index
    %c0_30 = arith.constant 0 : index
    %31 = vector.load %arg10[%c3, %c0_29, %c0_30] : memref<6x16x128xf32, #tpu.memory_space<vmem>>, vector<1x16x128xf32>
    %32 = vector.shape_cast %31 : vector<1x16x128xf32> to vector<16x128xf32>
    %c3_31 = arith.constant 3 : index
    %c0_32 = arith.constant 0 : index
    %c0_33 = arith.constant 0 : index
    %33 = vector.load %arg2[%c3_31, %c0_32, %c0_33] : memref<6x16x128xbf16, #tpu.memory_space<vmem>>, vector<1x16x128xbf16>
    %34 = vector.shape_cast %33 : vector<1x16x128xbf16> to vector<16x128xbf16>
    %cst_34 = arith.constant dense<0.000000e+00> : vector<16x128xf32>
    %35 = tpu.matmul %34, %3, %cst_34 {dimension_numbers = #tpu.dot_dimension_numbers<[1], [0], [0], [1], [0, 0, 1, 1], [], []>} : vector<16x128xbf16>, vector<128x128xbf16>, vector<16x128xf32> -> vector<16x128xf32>
    %36 = arith.addf %32, %35 : vector<16x128xf32>
    %c3_35 = arith.constant 3 : index
    %c0_36 = arith.constant 0 : index
    %c0_37 = arith.constant 0 : index
    %37 = vector.load %arg10[%c3_35, %c0_36, %c0_37] : memref<6x16x128xf32, #tpu.memory_space<vmem>>, vector<1x16x128xf32>
    %38 = vector.shape_cast %37 : vector<1x16x128xf32> to vector<16x128xf32>
    %39 = vector.shape_cast %36 : vector<16x128xf32> to vector<1x16x128xf32>
    tpu.vector_store %arg10[%c3_35, %c0_36, %c0_37], %39 {strides = array<i32>} : memref<6x16x128xf32, #tpu.memory_space<vmem>>, vector<1x16x128xf32>,
    %c4 = arith.constant 4 : index
    %c0_38 = arith.constant 0 : index
    %c0_39 = arith.constant 0 : index
    %40 = vector.load %arg10[%c4, %c0_38, %c0_39] : memref<6x16x128xf32, #tpu.memory_space<vmem>>, vector<1x16x128xf32>
    %41 = vector.shape_cast %40 : vector<1x16x128xf32> to vector<16x128xf32>
    %c4_40 = arith.constant 4 : index
    %c0_41 = arith.constant 0 : index
    %c0_42 = arith.constant 0 : index
    %42 = vector.load %arg2[%c4_40, %c0_41, %c0_42] : memref<6x16x128xbf16, #tpu.memory_space<vmem>>, vector<1x16x128xbf16>
    %43 = vector.shape_cast %42 : vector<1x16x128xbf16> to vector<16x128xbf16>
    %cst_43 = arith.constant dense<0.000000e+00> : vector<16x128xf32>
    %44 = tpu.matmul %43, %3, %cst_43 {dimension_numbers = #tpu.dot_dimension_numbers<[1], [0], [0], [1], [0, 0, 1, 1], [], []>} : vector<16x128xbf16>, vector<128x128xbf16>, vector<16x128xf32> -> vector<16x128xf32>
    %45 = arith.addf %41, %44 : vector<16x128xf32>
    %c4_44 = arith.constant 4 : index
    %c0_45 = arith.constant 0 : index
    %c0_46 = arith.constant 0 : index
    %46 = vector.load %arg10[%c4_44, %c0_45, %c0_46] : memref<6x16x128xf32, #tpu.memory_space<vmem>>, vector<1x16x128xf32>
    %47 = vector.shape_cast %46 : vector<1x16x128xf32> to vector<16x128xf32>
    %48 = vector.shape_cast %45 : vector<16x128xf32> to vector<1x16x128xf32>
    tpu.vector_store %arg10[%c4_44, %c0_45, %c0_46], %48 {strides = array<i32>} : memref<6x16x128xf32, #tpu.memory_space<vmem>>, vector<1x16x128xf32>,
    %c5 = arith.constant 5 : index
    %c0_47 = arith.constant 0 : index
    %c0_48 = arith.constant 0 : index
    %49 = vector.load %arg10[%c5, %c0_47, %c0_48] : memref<6x16x128xf32, #tpu.memory_space<vmem>>, vector<1x16x128xf32>
    %50 = vector.shape_cast %49 : vector<1x16x128xf32> to vector<16x128xf32>
    %c5_49 = arith.constant 5 : index
    %c0_50 = arith.constant 0 : index
    %c0_51 = arith.constant 0 : index
    %51 = vector.load %arg2[%c5_49, %c0_50, %c0_51] : memref<6x16x128xbf16, #tpu.memory_space<vmem>>, vector<1x16x128xbf16>
    %52 = vector.shape_cast %51 : vector<1x16x128xbf16> to vector<16x128xbf16>
    %cst_52 = arith.constant dense<0.000000e+00> : vector<16x128xf32>
    %53 = tpu.matmul %52, %3, %cst_52 {dimension_numbers = #tpu.dot_dimension_numbers<[1], [0], [0], [1], [0, 0, 1, 1], [], []>} : vector<16x128xbf16>, vector<128x128xbf16>, vector<16x128xf32> -> vector<16x128xf32>
    %54 = arith.addf %50, %53 : vector<16x128xf32>
    %c5_53 = arith.constant 5 : index
    %c0_54 = arith.constant 0 : index
    %c0_55 = arith.constant 0 : index
    %55 = vector.load %arg10[%c5_53, %c0_54, %c0_55] : memref<6x16x128xf32, #tpu.memory_space<vmem>>, vector<1x16x128xf32>
    %56 = vector.shape_cast %55 : vector<1x16x128xf32> to vector<16x128xf32>
    %57 = vector.shape_cast %54 : vector<16x128xf32> to vector<1x16x128xf32>
    tpu.vector_store %arg10[%c5_53, %c0_54, %c0_55], %57 {strides = array<i32>} : memref<6x16x128xf32, #tpu.memory_space<vmem>>, vector<1x16x128xf32>,
    %c0_i32_56 = arith.constant 0 : i32
    %58 = arith.cmpi eq, %arg1, %c0_i32_56 : i32
    %59 = arith.extui %58 : i1 to i32
    %c0_i32_57 = arith.constant 0 : i32
    %60 = arith.cmpi ne, %59, %c0_i32_57 : i32
    scf.if %60 {
      %c0_58 = arith.constant 0 : index
      %c0_59 = arith.constant 0 : index
      %c0_60 = arith.constant 0 : index
      %61 = vector.load %arg10[%c0_58, %c0_59, %c0_60] : memref<6x16x128xf32, #tpu.memory_space<vmem>>, vector<1x16x128xf32>
      %62 = vector.shape_cast %61 : vector<1x16x128xf32> to vector<16x128xf32>
      %63 = vector.extract_strided_slice %62 {offsets = [0, 32], sizes = [16, 1], strides = [1, 1]} : vector<16x128xf32> to vector<16x1xf32>
      %64 = arith.truncf %62 : vector<16x128xf32> to vector<16x128xbf16>
      %c0_61 = arith.constant 0 : index
      %c0_62 = arith.constant 0 : index
      %c0_63 = arith.constant 0 : index
      %65 = vector.load %arg5[%c0_61, %c0_62, %c0_63] : memref<6x128x128xbf16, #tpu.memory_space<vmem>>, vector<1x128x128xbf16>
      %66 = vector.shape_cast %65 : vector<1x128x128xbf16> to vector<128x128xbf16>
      %cst_64 = arith.constant dense<0.000000e+00> : vector<16x128xf32>
      %67 = tpu.matmul %64, %66, %cst_64 {dimension_numbers = #tpu.dot_dimension_numbers<[1], [0], [0], [1], [0, 0, 1, 1], [], []>} : vector<16x128xbf16>, vector<128x128xbf16>, vector<16x128xf32> -> vector<16x128xf32>
      %c1_65 = arith.constant 1 : index
      %c0_66 = arith.constant 0 : index
      %c0_67 = arith.constant 0 : index
      %68 = vector.load %arg10[%c1_65, %c0_66, %c0_67] : memref<6x16x128xf32, #tpu.memory_space<vmem>>, vector<1x16x128xf32>
      %69 = vector.shape_cast %68 : vector<1x16x128xf32> to vector<16x128xf32>
      %70 = vector.extract_strided_slice %69 {offsets = [0, 32], sizes = [16, 1], strides = [1, 1]} : vector<16x128xf32> to vector<16x1xf32>
      %71 = arith.addf %63, %70 : vector<16x1xf32>
      %72 = arith.truncf %69 : vector<16x128xf32> to vector<16x128xbf16>
      %c1_68 = arith.constant 1 : index
      %c0_69 = arith.constant 0 : index
      %c0_70 = arith.constant 0 : index
      %73 = vector.load %arg5[%c1_68, %c0_69, %c0_70] : memref<6x128x128xbf16, #tpu.memory_space<vmem>>, vector<1x128x128xbf16>
      %74 = vector.shape_cast %73 : vector<1x128x128xbf16> to vector<128x128xbf16>
      %cst_71 = arith.constant dense<0.000000e+00> : vector<16x128xf32>
      %75 = tpu.matmul %72, %74, %cst_71 {dimension_numbers = #tpu.dot_dimension_numbers<[1], [0], [0], [1], [0, 0, 1, 1], [], []>} : vector<16x128xbf16>, vector<128x128xbf16>, vector<16x128xf32> -> vector<16x128xf32>
      %76 = arith.addf %67, %75 : vector<16x128xf32>
      %c2_72 = arith.constant 2 : index
      %c0_73 = arith.constant 0 : index
      %c0_74 = arith.constant 0 : index
      %77 = vector.load %arg10[%c2_72, %c0_73, %c0_74] : memref<6x16x128xf32, #tpu.memory_space<vmem>>, vector<1x16x128xf32>
      %78 = vector.shape_cast %77 : vector<1x16x128xf32> to vector<16x128xf32>
      %79 = vector.extract_strided_slice %78 {offsets = [0, 32], sizes = [16, 1], strides = [1, 1]} : vector<16x128xf32> to vector<16x1xf32>
      %80 = arith.addf %71, %79 : vector<16x1xf32>
      %81 = arith.truncf %78 : vector<16x128xf32> to vector<16x128xbf16>
      %c2_75 = arith.constant 2 : index
      %c0_76 = arith.constant 0 : index
      %c0_77 = arith.constant 0 : index
      %82 = vector.load %arg5[%c2_75, %c0_76, %c0_77] : memref<6x128x128xbf16, #tpu.memory_space<vmem>>, vector<1x128x128xbf16>
      %83 = vector.shape_cast %82 : vector<1x128x128xbf16> to vector<128x128xbf16>
      %cst_78 = arith.constant dense<0.000000e+00> : vector<16x128xf32>
      %84 = tpu.matmul %81, %83, %cst_78 {dimension_numbers = #tpu.dot_dimension_numbers<[1], [0], [0], [1], [0, 0, 1, 1], [], []>} : vector<16x128xbf16>, vector<128x128xbf16>, vector<16x128xf32> -> vector<16x128xf32>
      %85 = arith.addf %76, %84 : vector<16x128xf32>
      %c3_79 = arith.constant 3 : index
      %c0_80 = arith.constant 0 : index
      %c0_81 = arith.constant 0 : index
      %86 = vector.load %arg10[%c3_79, %c0_80, %c0_81] : memref<6x16x128xf32, #tpu.memory_space<vmem>>, vector<1x16x128xf32>
      %87 = vector.shape_cast %86 : vector<1x16x128xf32> to vector<16x128xf32>
      %88 = vector.extract_strided_slice %87 {offsets = [0, 32], sizes = [16, 1], strides = [1, 1]} : vector<16x128xf32> to vector<16x1xf32>
      %89 = arith.addf %80, %88 : vector<16x1xf32>
      %90 = arith.truncf %87 : vector<16x128xf32> to vector<16x128xbf16>
      %c3_82 = arith.constant 3 : index
      %c0_83 = arith.constant 0 : index
      %c0_84 = arith.constant 0 : index
      %91 = vector.load %arg5[%c3_82, %c0_83, %c0_84] : memref<6x128x128xbf16, #tpu.memory_space<vmem>>, vector<1x128x128xbf16>
      %92 = vector.shape_cast %91 : vector<1x128x128xbf16> to vector<128x128xbf16>
      %cst_85 = arith.constant dense<0.000000e+00> : vector<16x128xf32>
      %93 = tpu.matmul %90, %92, %cst_85 {dimension_numbers = #tpu.dot_dimension_numbers<[1], [0], [0], [1], [0, 0, 1, 1], [], []>} : vector<16x128xbf16>, vector<128x128xbf16>, vector<16x128xf32> -> vector<16x128xf32>
      %94 = arith.addf %85, %93 : vector<16x128xf32>
      %c4_86 = arith.constant 4 : index
      %c0_87 = arith.constant 0 : index
      %c0_88 = arith.constant 0 : index
      %95 = vector.load %arg10[%c4_86, %c0_87, %c0_88] : memref<6x16x128xf32, #tpu.memory_space<vmem>>, vector<1x16x128xf32>
      %96 = vector.shape_cast %95 : vector<1x16x128xf32> to vector<16x128xf32>
      %97 = vector.extract_strided_slice %96 {offsets = [0, 32], sizes = [16, 1], strides = [1, 1]} : vector<16x128xf32> to vector<16x1xf32>
      %98 = arith.addf %89, %97 : vector<16x1xf32>
      %99 = arith.truncf %96 : vector<16x128xf32> to vector<16x128xbf16>
      %c4_89 = arith.constant 4 : index
      %c0_90 = arith.constant 0 : index
      %c0_91 = arith.constant 0 : index
      %100 = vector.load %arg5[%c4_89, %c0_90, %c0_91] : memref<6x128x128xbf16, #tpu.memory_space<vmem>>, vector<1x128x128xbf16>
      %101 = vector.shape_cast %100 : vector<1x128x128xbf16> to vector<128x128xbf16>
      %cst_92 = arith.constant dense<0.000000e+00> : vector<16x128xf32>
      %102 = tpu.matmul %99, %101, %cst_92 {dimension_numbers = #tpu.dot_dimension_numbers<[1], [0], [0], [1], [0, 0, 1, 1], [], []>} : vector<16x128xbf16>, vector<128x128xbf16>, vector<16x128xf32> -> vector<16x128xf32>
      %103 = arith.addf %94, %102 : vector<16x128xf32>
      %c5_93 = arith.constant 5 : index
      %c0_94 = arith.constant 0 : index
      %c0_95 = arith.constant 0 : index
      %104 = vector.load %arg10[%c5_93, %c0_94, %c0_95] : memref<6x16x128xf32, #tpu.memory_space<vmem>>, vector<1x16x128xf32>
      %105 = vector.shape_cast %104 : vector<1x16x128xf32> to vector<16x128xf32>
      %106 = vector.extract_strided_slice %105 {offsets = [0, 32], sizes = [16, 1], strides = [1, 1]} : vector<16x128xf32> to vector<16x1xf32>
      %107 = arith.addf %98, %106 : vector<16x1xf32>
      %108 = arith.truncf %105 : vector<16x128xf32> to vector<16x128xbf16>
      %c5_96 = arith.constant 5 : index
      %c0_97 = arith.constant 0 : index
      %c0_98 = arith.constant 0 : index
      %109 = vector.load %arg5[%c5_96, %c0_97, %c0_98] : memref<6x128x128xbf16, #tpu.memory_space<vmem>>, vector<1x128x128xbf16>
      %110 = vector.shape_cast %109 : vector<1x128x128xbf16> to vector<128x128xbf16>
      %cst_99 = arith.constant dense<0.000000e+00> : vector<16x128xf32>
      %111 = tpu.matmul %108, %110, %cst_99 {dimension_numbers = #tpu.dot_dimension_numbers<[1], [0], [0], [1], [0, 0, 1, 1], [], []>} : vector<16x128xbf16>, vector<128x128xbf16>, vector<16x128xf32> -> vector<16x128xf32>
      %112 = arith.addf %103, %111 : vector<16x128xf32>
      %cst_100 = arith.constant 5.000000e-01 : f32
      %113 = vector.broadcast %cst_100 : f32 to vector<16x1xf32>
      %114 = arith.cmpf ogt, %107, %113 : vector<16x1xf32>
      %cst_101 = arith.constant 1.000000e+00 : f32
      %115 = vector.broadcast %cst_101 : f32 to vector<16x1xf32>
      %116 = arith.maximumf %107, %115 : vector<16x1xf32>
      %cst_102 = arith.constant 1.000000e+00 : f32
      %117 = vector.broadcast %cst_102 : f32 to vector<16x1xf32>
      %118 = arith.divf %117, %116 : vector<16x1xf32>
      %cst_103 = arith.constant 0.000000e+00 : f32
      %119 = vector.broadcast %cst_103 : f32 to vector<16x1xf32>
      %120 = arith.select %114, %118, %119 : vector<16x1xi1>, vector<16x1xf32>
      %121 = vector.broadcast %120 : vector<16x1xf32> to vector<16x128xf32>
      %122 = arith.mulf %112, %121 : vector<16x128xf32>
      %123 = arith.truncf %122 : vector<16x128xf32> to vector<16x128xbf16>
      %c0_104 = arith.constant 0 : index
      %c0_105 = arith.constant 0 : index
      %124 = vector.load %arg4[%c0_104, %c0_105] : memref<16x128xbf16, #tpu.memory_space<vmem>>, vector<16x128xbf16>
      %c0_106 = arith.constant 0 : index
      %c0_107 = arith.constant 0 : index
      %125 = vector.load %arg6[%c0_106, %c0_107] : memref<128x128xbf16, #tpu.memory_space<vmem>>, vector<128x128xbf16>
      %cst_108 = arith.constant dense<0.000000e+00> : vector<16x128xf32>
      %126 = tpu.matmul %124, %125, %cst_108 {dimension_numbers = #tpu.dot_dimension_numbers<[1], [0], [0], [1], [0, 0, 1, 1], [], []>} : vector<16x128xbf16>, vector<128x128xbf16>, vector<16x128xf32> -> vector<16x128xf32>
      %c0_109 = arith.constant 0 : index
      %c0_110 = arith.constant 0 : index
      %127 = vector.load %arg7[%c0_109, %c0_110] : memref<128x128xbf16, #tpu.memory_space<vmem>>, vector<128x128xbf16>
      %cst_111 = arith.constant dense<0.000000e+00> : vector<16x128xf32>
      %128 = tpu.matmul %123, %127, %cst_111 {dimension_numbers = #tpu.dot_dimension_numbers<[1], [0], [0], [1], [0, 0, 1, 1], [], []>} : vector<16x128xbf16>, vector<128x128xbf16>, vector<16x128xf32> -> vector<16x128xf32>
      %129 = arith.addf %126, %128 : vector<16x128xf32>
      %c0_112 = arith.constant 0 : index
      %c0_113 = arith.constant 0 : index
      %130 = vector.load %arg8[%c0_112, %c0_113] : memref<1x128xf32, #tpu.memory_space<vmem>>, vector<1x128xf32>
      %131 = vector.broadcast %130 : vector<1x128xf32> to vector<16x128xf32>
      %132 = arith.addf %129, %131 : vector<16x128xf32>
      %cst_114 = arith.constant 0.000000e+00 : f32
      %133 = vector.broadcast %cst_114 : f32 to vector<16x128xf32>
      %134 = arith.maximumf %132, %133 : vector<16x128xf32>
      %c0_115 = arith.constant 0 : index
      %c0_116 = arith.constant 0 : index
      %135 = vector.load %arg9[%c0_115, %c0_116] : memref<16x128xf32, #tpu.memory_space<vmem>>, vector<16x128xf32>
      tpu.vector_store %arg9[%c0_115, %c0_116], %134 {strides = array<i32>} : memref<16x128xf32, #tpu.memory_space<vmem>>, vector<16x128xf32>,
    } else {
    }
    return
  }
  func.func @transform_0(%arg0: i32, %arg1: i32) -> (i32, i32, i32) {
    %c0_i32 = arith.constant 0 : i32
    %c0_i32_0 = arith.constant 0 : i32
    return %c0_i32, %arg0, %arg1 : i32, i32, i32
  }
  func.func @transform_1(%arg0: i32, %arg1: i32) -> (i32, i32) {
    %c0_i32 = arith.constant 0 : i32
    %c0_i32_0 = arith.constant 0 : i32
    return %arg1, %c0_i32 : i32, i32
  }
  func.func @transform_2(%arg0: i32, %arg1: i32) -> (i32, i32) {
    %c0_i32 = arith.constant 0 : i32
    %c0_i32_0 = arith.constant 0 : i32
    return %arg0, %c0_i32 : i32, i32
  }
  func.func @transform_3(%arg0: i32, %arg1: i32) -> (i32, i32, i32) {
    %c0_i32 = arith.constant 0 : i32
    %c0_i32_0 = arith.constant 0 : i32
    %c0_i32_1 = arith.constant 0 : i32
    %c0_i32_2 = arith.constant 0 : i32
    return %c0_i32, %c0_i32_0, %c0_i32_1 : i32, i32, i32
  }
  func.func @transform_4(%arg0: i32, %arg1: i32) -> (i32, i32) {
    %c0_i32 = arith.constant 0 : i32
    %c0_i32_0 = arith.constant 0 : i32
    %c0_i32_1 = arith.constant 0 : i32
    return %c0_i32, %c0_i32_0 : i32, i32
  }
  func.func @transform_5(%arg0: i32, %arg1: i32) -> (i32, i32) {
    %c0_i32 = arith.constant 0 : i32
    %c0_i32_0 = arith.constant 0 : i32
    %c0_i32_1 = arith.constant 0 : i32
    return %c0_i32, %c0_i32_0 : i32, i32
  }
  func.func @transform_6(%arg0: i32, %arg1: i32) -> (i32, i32) {
    %c0_i32 = arith.constant 0 : i32
    %c0_i32_0 = arith.constant 0 : i32
    %c0_i32_1 = arith.constant 0 : i32
    return %c0_i32, %c0_i32_0 : i32, i32
  }
  func.func @transform_7(%arg0: i32, %arg1: i32) -> (i32, i32) {
    %c0_i32 = arith.constant 0 : i32
    %c0_i32_0 = arith.constant 0 : i32
    return %arg0, %c0_i32 : i32, i32
  }
}

module attributes {stable_mosaic.version = 11 : i64} {
  func.func @_gcmc_conv_kernel(%arg0: i32, %arg1: i32, %arg2: memref<6x16x128xbf16, #tpu.memory_space<vmem>>, %arg3: memref<128x128xbf16, #tpu.memory_space<vmem>>, %arg4: memref<16x128xbf16, #tpu.memory_space<vmem>>, %arg5: memref<6x128x128xbf16, #tpu.memory_space<vmem>>, %arg6: memref<128x128xbf16, #tpu.memory_space<vmem>>, %arg7: memref<128x128xbf16, #tpu.memory_space<vmem>>, %arg8: memref<1x128xf32, #tpu.memory_space<vmem>>, %arg9: memref<16x128xf32, #tpu.memory_space<vmem>>, %arg10: memref<6x16x128xf32, #tpu.memory_space<vmem>>) attributes {dimension_semantics = [#tpu.dimension_semantics<parallel>, #tpu.dimension_semantics<arbitrary>], iteration_bounds = array<i64: 1, 1>, scalar_prefetch = 0 : i64, scratch_operands = 1 : i64, tpu.core_type = #tpu.core_type<tc>, window_params = [{transform_indices = @transform_0, window_bounds = array<i64: 6, 16, 128>}, {transform_indices = @transform_1, window_bounds = array<i64: 128, 128>}, {transform_indices = @transform_2, window_bounds = array<i64: 16, 128>}, {pipeline_mode = #tpu.pipeline_mode<synchronous>, transform_indices = @transform_3, window_bounds = array<i64: 6, 128, 128>}, {pipeline_mode = #tpu.pipeline_mode<synchronous>, transform_indices = @transform_4, window_bounds = array<i64: 128, 128>}, {pipeline_mode = #tpu.pipeline_mode<synchronous>, transform_indices = @transform_5, window_bounds = array<i64: 128, 128>}, {pipeline_mode = #tpu.pipeline_mode<synchronous>, transform_indices = @transform_6, window_bounds = array<i64: 1, 128>}, {transform_indices = @transform_7, window_bounds = array<i64: 16, 128>}]} {
    %c0_i32 = arith.constant 0 : i32
    %0 = arith.cmpi eq, %arg1, %c0_i32 : i32
    %1 = arith.extui %0 : i1 to i32
    %c0_i32_0 = arith.constant 0 : i32
    %2 = arith.cmpi ne, %1, %c0_i32_0 : i32
    scf.if %2 {
      %cst_58 = arith.constant 0.000000e+00 : f32
      %61 = vector.broadcast %cst_58 : f32 to vector<6x16x128xf32>
      %c0_59 = arith.constant 0 : index
      %c0_60 = arith.constant 0 : index
      %c0_61 = arith.constant 0 : index
      %62 = vector.load %arg10[%c0_59, %c0_60, %c0_61] : memref<6x16x128xf32, #tpu.memory_space<vmem>>, vector<6x16x128xf32>
      tpu.vector_store %arg10[%c0_59, %c0_60, %c0_61], %61 {strides = array<i32>} : memref<6x16x128xf32, #tpu.memory_space<vmem>>, vector<6x16x128xf32>,
    } else {
    }
    %c0 = arith.constant 0 : index
    %c0_1 = arith.constant 0 : index
    %3 = vector.load %arg3[%c0, %c0_1] : memref<128x128xbf16, #tpu.memory_space<vmem>>, vector<128x128xbf16>
    %c0_2 = arith.constant 0 : index
    %c0_3 = arith.constant 0 : index
    %c0_4 = arith.constant 0 : index
    %4 = vector.load %arg10[%c0_2, %c0_3, %c0_4] : memref<6x16x128xf32, #tpu.memory_space<vmem>>, vector<1x16x128xf32>
    %5 = vector.shape_cast %4 : vector<1x16x128xf32> to vector<16x128xf32>
    %c0_5 = arith.constant 0 : index
    %c0_6 = arith.constant 0 : index
    %c0_7 = arith.constant 0 : index
    %6 = vector.load %arg2[%c0_5, %c0_6, %c0_7] : memref<6x16x128xbf16, #tpu.memory_space<vmem>>, vector<1x16x128xbf16>
    %7 = vector.shape_cast %6 : vector<1x16x128xbf16> to vector<16x128xbf16>
    %cst = arith.constant dense<0.000000e+00> : vector<16x128xf32>
    %8 = tpu.matmul %7, %3, %cst {dimension_numbers = #tpu.dot_dimension_numbers<[1], [0], [0], [1], [0, 0, 1, 1], [], []>} : vector<16x128xbf16>, vector<128x128xbf16>, vector<16x128xf32> -> vector<16x128xf32>
    %9 = arith.addf %5, %8 : vector<16x128xf32>
    %c0_8 = arith.constant 0 : index
    %c0_9 = arith.constant 0 : index
    %c0_10 = arith.constant 0 : index
    %10 = vector.load %arg10[%c0_8, %c0_9, %c0_10] : memref<6x16x128xf32, #tpu.memory_space<vmem>>, vector<1x16x128xf32>
    %11 = vector.shape_cast %10 : vector<1x16x128xf32> to vector<16x128xf32>
    %12 = vector.shape_cast %9 : vector<16x128xf32> to vector<1x16x128xf32>
    tpu.vector_store %arg10[%c0_8, %c0_9, %c0_10], %12 {strides = array<i32>} : memref<6x16x128xf32, #tpu.memory_space<vmem>>, vector<1x16x128xf32>,
    %c1 = arith.constant 1 : index
    %c0_11 = arith.constant 0 : index
    %c0_12 = arith.constant 0 : index
    %13 = vector.load %arg10[%c1, %c0_11, %c0_12] : memref<6x16x128xf32, #tpu.memory_space<vmem>>, vector<1x16x128xf32>
    %14 = vector.shape_cast %13 : vector<1x16x128xf32> to vector<16x128xf32>
    %c1_13 = arith.constant 1 : index
    %c0_14 = arith.constant 0 : index
    %c0_15 = arith.constant 0 : index
    %15 = vector.load %arg2[%c1_13, %c0_14, %c0_15] : memref<6x16x128xbf16, #tpu.memory_space<vmem>>, vector<1x16x128xbf16>
    %16 = vector.shape_cast %15 : vector<1x16x128xbf16> to vector<16x128xbf16>
    %cst_16 = arith.constant dense<0.000000e+00> : vector<16x128xf32>
    %17 = tpu.matmul %16, %3, %cst_16 {dimension_numbers = #tpu.dot_dimension_numbers<[1], [0], [0], [1], [0, 0, 1, 1], [], []>} : vector<16x128xbf16>, vector<128x128xbf16>, vector<16x128xf32> -> vector<16x128xf32>
    %18 = arith.addf %14, %17 : vector<16x128xf32>
    %c1_17 = arith.constant 1 : index
    %c0_18 = arith.constant 0 : index
    %c0_19 = arith.constant 0 : index
    %19 = vector.load %arg10[%c1_17, %c0_18, %c0_19] : memref<6x16x128xf32, #tpu.memory_space<vmem>>, vector<1x16x128xf32>
    %20 = vector.shape_cast %19 : vector<1x16x128xf32> to vector<16x128xf32>
    %21 = vector.shape_cast %18 : vector<16x128xf32> to vector<1x16x128xf32>
    tpu.vector_store %arg10[%c1_17, %c0_18, %c0_19], %21 {strides = array<i32>} : memref<6x16x128xf32, #tpu.memory_space<vmem>>, vector<1x16x128xf32>,
    %c2 = arith.constant 2 : index
    %c0_20 = arith.constant 0 : index
    %c0_21 = arith.constant 0 : index
    %22 = vector.load %arg10[%c2, %c0_20, %c0_21] : memref<6x16x128xf32, #tpu.memory_space<vmem>>, vector<1x16x128xf32>
    %23 = vector.shape_cast %22 : vector<1x16x128xf32> to vector<16x128xf32>
    %c2_22 = arith.constant 2 : index
    %c0_23 = arith.constant 0 : index
    %c0_24 = arith.constant 0 : index
    %24 = vector.load %arg2[%c2_22, %c0_23, %c0_24] : memref<6x16x128xbf16, #tpu.memory_space<vmem>>, vector<1x16x128xbf16>
    %25 = vector.shape_cast %24 : vector<1x16x128xbf16> to vector<16x128xbf16>
    %cst_25 = arith.constant dense<0.000000e+00> : vector<16x128xf32>
    %26 = tpu.matmul %25, %3, %cst_25 {dimension_numbers = #tpu.dot_dimension_numbers<[1], [0], [0], [1], [0, 0, 1, 1], [], []>} : vector<16x128xbf16>, vector<128x128xbf16>, vector<16x128xf32> -> vector<16x128xf32>
    %27 = arith.addf %23, %26 : vector<16x128xf32>
    %c2_26 = arith.constant 2 : index
    %c0_27 = arith.constant 0 : index
    %c0_28 = arith.constant 0 : index
    %28 = vector.load %arg10[%c2_26, %c0_27, %c0_28] : memref<6x16x128xf32, #tpu.memory_space<vmem>>, vector<1x16x128xf32>
    %29 = vector.shape_cast %28 : vector<1x16x128xf32> to vector<16x128xf32>
    %30 = vector.shape_cast %27 : vector<16x128xf32> to vector<1x16x128xf32>
    tpu.vector_store %arg10[%c2_26, %c0_27, %c0_28], %30 {strides = array<i32>} : memref<6x16x128xf32, #tpu.memory_space<vmem>>, vector<1x16x128xf32>,
    %c3 = arith.constant 3 : index
    %c0_29 = arith.constant 0 : index
    %c0_30 = arith.constant 0 : index
    %31 = vector.load %arg10[%c3, %c0_29, %c0_30] : memref<6x16x128xf32, #tpu.memory_space<vmem>>, vector<1x16x128xf32>
    %32 = vector.shape_cast %31 : vector<1x16x128xf32> to vector<16x128xf32>
    %c3_31 = arith.constant 3 : index
    %c0_32 = arith.constant 0 : index
    %c0_33 = arith.constant 0 : index
    %33 = vector.load %arg2[%c3_31, %c0_32, %c0_33] : memref<6x16x128xbf16, #tpu.memory_space<vmem>>, vector<1x16x128xbf16>
    %34 = vector.shape_cast %33 : vector<1x16x128xbf16> to vector<16x128xbf16>
    %cst_34 = arith.constant dense<0.000000e+00> : vector<16x128xf32>
    %35 = tpu.matmul %34, %3, %cst_34 {dimension_numbers = #tpu.dot_dimension_numbers<[1], [0], [0], [1], [0, 0, 1, 1], [], []>} : vector<16x128xbf16>, vector<128x128xbf16>, vector<16x128xf32> -> vector<16x128xf32>
    %36 = arith.addf %32, %35 : vector<16x128xf32>
    %c3_35 = arith.constant 3 : index
    %c0_36 = arith.constant 0 : index
    %c0_37 = arith.constant 0 : index
    %37 = vector.load %arg10[%c3_35, %c0_36, %c0_37] : memref<6x16x128xf32, #tpu.memory_space<vmem>>, vector<1x16x128xf32>
    %38 = vector.shape_cast %37 : vector<1x16x128xf32> to vector<16x128xf32>
    %39 = vector.shape_cast %36 : vector<16x128xf32> to vector<1x16x128xf32>
    tpu.vector_store %arg10[%c3_35, %c0_36, %c0_37], %39 {strides = array<i32>} : memref<6x16x128xf32, #tpu.memory_space<vmem>>, vector<1x16x128xf32>,
    %c4 = arith.constant 4 : index
    %c0_38 = arith.constant 0 : index
    %c0_39 = arith.constant 0 : index
    %40 = vector.load %arg10[%c4, %c0_38, %c0_39] : memref<6x16x128xf32, #tpu.memory_space<vmem>>, vector<1x16x128xf32>
    %41 = vector.shape_cast %40 : vector<1x16x128xf32> to vector<16x128xf32>
    %c4_40 = arith.constant 4 : index
    %c0_41 = arith.constant 0 : index
    %c0_42 = arith.constant 0 : index
    %42 = vector.load %arg2[%c4_40, %c0_41, %c0_42] : memref<6x16x128xbf16, #tpu.memory_space<vmem>>, vector<1x16x128xbf16>
    %43 = vector.shape_cast %42 : vector<1x16x128xbf16> to vector<16x128xbf16>
    %cst_43 = arith.constant dense<0.000000e+00> : vector<16x128xf32>
    %44 = tpu.matmul %43, %3, %cst_43 {dimension_numbers = #tpu.dot_dimension_numbers<[1], [0], [0], [1], [0, 0, 1, 1], [], []>} : vector<16x128xbf16>, vector<128x128xbf16>, vector<16x128xf32> -> vector<16x128xf32>
    %45 = arith.addf %41, %44 : vector<16x128xf32>
    %c4_44 = arith.constant 4 : index
    %c0_45 = arith.constant 0 : index
    %c0_46 = arith.constant 0 : index
    %46 = vector.load %arg10[%c4_44, %c0_45, %c0_46] : memref<6x16x128xf32, #tpu.memory_space<vmem>>, vector<1x16x128xf32>
    %47 = vector.shape_cast %46 : vector<1x16x128xf32> to vector<16x128xf32>
    %48 = vector.shape_cast %45 : vector<16x128xf32> to vector<1x16x128xf32>
    tpu.vector_store %arg10[%c4_44, %c0_45, %c0_46], %48 {strides = array<i32>} : memref<6x16x128xf32, #tpu.memory_space<vmem>>, vector<1x16x128xf32>,
    %c5 = arith.constant 5 : index
    %c0_47 = arith.constant 0 : index
    %c0_48 = arith.constant 0 : index
    %49 = vector.load %arg10[%c5, %c0_47, %c0_48] : memref<6x16x128xf32, #tpu.memory_space<vmem>>, vector<1x16x128xf32>
    %50 = vector.shape_cast %49 : vector<1x16x128xf32> to vector<16x128xf32>
    %c5_49 = arith.constant 5 : index
    %c0_50 = arith.constant 0 : index
    %c0_51 = arith.constant 0 : index
    %51 = vector.load %arg2[%c5_49, %c0_50, %c0_51] : memref<6x16x128xbf16, #tpu.memory_space<vmem>>, vector<1x16x128xbf16>
    %52 = vector.shape_cast %51 : vector<1x16x128xbf16> to vector<16x128xbf16>
    %cst_52 = arith.constant dense<0.000000e+00> : vector<16x128xf32>
    %53 = tpu.matmul %52, %3, %cst_52 {dimension_numbers = #tpu.dot_dimension_numbers<[1], [0], [0], [1], [0, 0, 1, 1], [], []>} : vector<16x128xbf16>, vector<128x128xbf16>, vector<16x128xf32> -> vector<16x128xf32>
    %54 = arith.addf %50, %53 : vector<16x128xf32>
    %c5_53 = arith.constant 5 : index
    %c0_54 = arith.constant 0 : index
    %c0_55 = arith.constant 0 : index
    %55 = vector.load %arg10[%c5_53, %c0_54, %c0_55] : memref<6x16x128xf32, #tpu.memory_space<vmem>>, vector<1x16x128xf32>
    %56 = vector.shape_cast %55 : vector<1x16x128xf32> to vector<16x128xf32>
    %57 = vector.shape_cast %54 : vector<16x128xf32> to vector<1x16x128xf32>
    tpu.vector_store %arg10[%c5_53, %c0_54, %c0_55], %57 {strides = array<i32>} : memref<6x16x128xf32, #tpu.memory_space<vmem>>, vector<1x16x128xf32>,
    %c0_i32_56 = arith.constant 0 : i32
    %58 = arith.cmpi eq, %arg1, %c0_i32_56 : i32
    %59 = arith.extui %58 : i1 to i32
    %c0_i32_57 = arith.constant 0 : i32
    %60 = arith.cmpi ne, %59, %c0_i32_57 : i32
    scf.if %60 {
      %c0_58 = arith.constant 0 : index
      %c0_59 = arith.constant 0 : index
      %c0_60 = arith.constant 0 : index
      %61 = vector.load %arg10[%c0_58, %c0_59, %c0_60] : memref<6x16x128xf32, #tpu.memory_space<vmem>>, vector<1x16x128xf32>
      %62 = vector.shape_cast %61 : vector<1x16x128xf32> to vector<16x128xf32>
      %63 = vector.extract_strided_slice %62 {offsets = [0, 32], sizes = [16, 1], strides = [1, 1]} : vector<16x128xf32> to vector<16x1xf32>
      %64 = arith.truncf %62 : vector<16x128xf32> to vector<16x128xbf16>
      %c0_61 = arith.constant 0 : index
      %c0_62 = arith.constant 0 : index
      %c0_63 = arith.constant 0 : index
      %65 = vector.load %arg5[%c0_61, %c0_62, %c0_63] : memref<6x128x128xbf16, #tpu.memory_space<vmem>>, vector<1x128x128xbf16>
      %66 = vector.shape_cast %65 : vector<1x128x128xbf16> to vector<128x128xbf16>
      %cst_64 = arith.constant dense<0.000000e+00> : vector<16x128xf32>
      %67 = tpu.matmul %64, %66, %cst_64 {dimension_numbers = #tpu.dot_dimension_numbers<[1], [0], [0], [1], [0, 0, 1, 1], [], []>} : vector<16x128xbf16>, vector<128x128xbf16>, vector<16x128xf32> -> vector<16x128xf32>
      %c1_65 = arith.constant 1 : index
      %c0_66 = arith.constant 0 : index
      %c0_67 = arith.constant 0 : index
      %68 = vector.load %arg10[%c1_65, %c0_66, %c0_67] : memref<6x16x128xf32, #tpu.memory_space<vmem>>, vector<1x16x128xf32>
      %69 = vector.shape_cast %68 : vector<1x16x128xf32> to vector<16x128xf32>
      %70 = vector.extract_strided_slice %69 {offsets = [0, 32], sizes = [16, 1], strides = [1, 1]} : vector<16x128xf32> to vector<16x1xf32>
      %71 = arith.addf %63, %70 : vector<16x1xf32>
      %72 = arith.truncf %69 : vector<16x128xf32> to vector<16x128xbf16>
      %c1_68 = arith.constant 1 : index
      %c0_69 = arith.constant 0 : index
      %c0_70 = arith.constant 0 : index
      %73 = vector.load %arg5[%c1_68, %c0_69, %c0_70] : memref<6x128x128xbf16, #tpu.memory_space<vmem>>, vector<1x128x128xbf16>
      %74 = vector.shape_cast %73 : vector<1x128x128xbf16> to vector<128x128xbf16>
      %cst_71 = arith.constant dense<0.000000e+00> : vector<16x128xf32>
      %75 = tpu.matmul %72, %74, %cst_71 {dimension_numbers = #tpu.dot_dimension_numbers<[1], [0], [0], [1], [0, 0, 1, 1], [], []>} : vector<16x128xbf16>, vector<128x128xbf16>, vector<16x128xf32> -> vector<16x128xf32>
      %76 = arith.addf %67, %75 : vector<16x128xf32>
      %c2_72 = arith.constant 2 : index
      %c0_73 = arith.constant 0 : index
      %c0_74 = arith.constant 0 : index
      %77 = vector.load %arg10[%c2_72, %c0_73, %c0_74] : memref<6x16x128xf32, #tpu.memory_space<vmem>>, vector<1x16x128xf32>
      %78 = vector.shape_cast %77 : vector<1x16x128xf32> to vector<16x128xf32>
      %79 = vector.extract_strided_slice %78 {offsets = [0, 32], sizes = [16, 1], strides = [1, 1]} : vector<16x128xf32> to vector<16x1xf32>
      %80 = arith.addf %71, %79 : vector<16x1xf32>
      %81 = arith.truncf %78 : vector<16x128xf32> to vector<16x128xbf16>
      %c2_75 = arith.constant 2 : index
      %c0_76 = arith.constant 0 : index
      %c0_77 = arith.constant 0 : index
      %82 = vector.load %arg5[%c2_75, %c0_76, %c0_77] : memref<6x128x128xbf16, #tpu.memory_space<vmem>>, vector<1x128x128xbf16>
      %83 = vector.shape_cast %82 : vector<1x128x128xbf16> to vector<128x128xbf16>
      %cst_78 = arith.constant dense<0.000000e+00> : vector<16x128xf32>
      %84 = tpu.matmul %81, %83, %cst_78 {dimension_numbers = #tpu.dot_dimension_numbers<[1], [0], [0], [1], [0, 0, 1, 1], [], []>} : vector<16x128xbf16>, vector<128x128xbf16>, vector<16x128xf32> -> vector<16x128xf32>
      %85 = arith.addf %76, %84 : vector<16x128xf32>
      %c3_79 = arith.constant 3 : index
      %c0_80 = arith.constant 0 : index
      %c0_81 = arith.constant 0 : index
      %86 = vector.load %arg10[%c3_79, %c0_80, %c0_81] : memref<6x16x128xf32, #tpu.memory_space<vmem>>, vector<1x16x128xf32>
      %87 = vector.shape_cast %86 : vector<1x16x128xf32> to vector<16x128xf32>
      %88 = vector.extract_strided_slice %87 {offsets = [0, 32], sizes = [16, 1], strides = [1, 1]} : vector<16x128xf32> to vector<16x1xf32>
      %89 = arith.addf %80, %88 : vector<16x1xf32>
      %90 = arith.truncf %87 : vector<16x128xf32> to vector<16x128xbf16>
      %c3_82 = arith.constant 3 : index
      %c0_83 = arith.constant 0 : index
      %c0_84 = arith.constant 0 : index
      %91 = vector.load %arg5[%c3_82, %c0_83, %c0_84] : memref<6x128x128xbf16, #tpu.memory_space<vmem>>, vector<1x128x128xbf16>
      %92 = vector.shape_cast %91 : vector<1x128x128xbf16> to vector<128x128xbf16>
      %cst_85 = arith.constant dense<0.000000e+00> : vector<16x128xf32>
      %93 = tpu.matmul %90, %92, %cst_85 {dimension_numbers = #tpu.dot_dimension_numbers<[1], [0], [0], [1], [0, 0, 1, 1], [], []>} : vector<16x128xbf16>, vector<128x128xbf16>, vector<16x128xf32> -> vector<16x128xf32>
      %94 = arith.addf %85, %93 : vector<16x128xf32>
      %c4_86 = arith.constant 4 : index
      %c0_87 = arith.constant 0 : index
      %c0_88 = arith.constant 0 : index
      %95 = vector.load %arg10[%c4_86, %c0_87, %c0_88] : memref<6x16x128xf32, #tpu.memory_space<vmem>>, vector<1x16x128xf32>
      %96 = vector.shape_cast %95 : vector<1x16x128xf32> to vector<16x128xf32>
      %97 = vector.extract_strided_slice %96 {offsets = [0, 32], sizes = [16, 1], strides = [1, 1]} : vector<16x128xf32> to vector<16x1xf32>
      %98 = arith.addf %89, %97 : vector<16x1xf32>
      %99 = arith.truncf %96 : vector<16x128xf32> to vector<16x128xbf16>
      %c4_89 = arith.constant 4 : index
      %c0_90 = arith.constant 0 : index
      %c0_91 = arith.constant 0 : index
      %100 = vector.load %arg5[%c4_89, %c0_90, %c0_91] : memref<6x128x128xbf16, #tpu.memory_space<vmem>>, vector<1x128x128xbf16>
      %101 = vector.shape_cast %100 : vector<1x128x128xbf16> to vector<128x128xbf16>
      %cst_92 = arith.constant dense<0.000000e+00> : vector<16x128xf32>
      %102 = tpu.matmul %99, %101, %cst_92 {dimension_numbers = #tpu.dot_dimension_numbers<[1], [0], [0], [1], [0, 0, 1, 1], [], []>} : vector<16x128xbf16>, vector<128x128xbf16>, vector<16x128xf32> -> vector<16x128xf32>
      %103 = arith.addf %94, %102 : vector<16x128xf32>
      %c5_93 = arith.constant 5 : index
      %c0_94 = arith.constant 0 : index
      %c0_95 = arith.constant 0 : index
      %104 = vector.load %arg10[%c5_93, %c0_94, %c0_95] : memref<6x16x128xf32, #tpu.memory_space<vmem>>, vector<1x16x128xf32>
      %105 = vector.shape_cast %104 : vector<1x16x128xf32> to vector<16x128xf32>
      %106 = vector.extract_strided_slice %105 {offsets = [0, 32], sizes = [16, 1], strides = [1, 1]} : vector<16x128xf32> to vector<16x1xf32>
      %107 = arith.addf %98, %106 : vector<16x1xf32>
      %108 = arith.truncf %105 : vector<16x128xf32> to vector<16x128xbf16>
      %c5_96 = arith.constant 5 : index
      %c0_97 = arith.constant 0 : index
      %c0_98 = arith.constant 0 : index
      %109 = vector.load %arg5[%c5_96, %c0_97, %c0_98] : memref<6x128x128xbf16, #tpu.memory_space<vmem>>, vector<1x128x128xbf16>
      %110 = vector.shape_cast %109 : vector<1x128x128xbf16> to vector<128x128xbf16>
      %cst_99 = arith.constant dense<0.000000e+00> : vector<16x128xf32>
      %111 = tpu.matmul %108, %110, %cst_99 {dimension_numbers = #tpu.dot_dimension_numbers<[1], [0], [0], [1], [0, 0, 1, 1], [], []>} : vector<16x128xbf16>, vector<128x128xbf16>, vector<16x128xf32> -> vector<16x128xf32>
      %112 = arith.addf %103, %111 : vector<16x128xf32>
      %cst_100 = arith.constant 5.000000e-01 : f32
      %113 = vector.broadcast %cst_100 : f32 to vector<16x1xf32>
      %114 = arith.cmpf ogt, %107, %113 : vector<16x1xf32>
      %cst_101 = arith.constant 1.000000e+00 : f32
      %115 = vector.broadcast %cst_101 : f32 to vector<16x1xf32>
      %116 = arith.maximumf %107, %115 : vector<16x1xf32>
      %cst_102 = arith.constant 1.000000e+00 : f32
      %117 = vector.broadcast %cst_102 : f32 to vector<16x1xf32>
      %118 = arith.divf %117, %116 : vector<16x1xf32>
      %cst_103 = arith.constant 0.000000e+00 : f32
      %119 = vector.broadcast %cst_103 : f32 to vector<16x1xf32>
      %120 = arith.select %114, %118, %119 : vector<16x1xi1>, vector<16x1xf32>
      %121 = vector.broadcast %120 : vector<16x1xf32> to vector<16x128xf32>
      %122 = arith.mulf %112, %121 : vector<16x128xf32>
      %123 = arith.truncf %122 : vector<16x128xf32> to vector<16x128xbf16>
      %c0_104 = arith.constant 0 : index
      %c0_105 = arith.constant 0 : index
      %124 = vector.load %arg4[%c0_104, %c0_105] : memref<16x128xbf16, #tpu.memory_space<vmem>>, vector<16x128xbf16>
      %c0_106 = arith.constant 0 : index
      %c0_107 = arith.constant 0 : index
      %125 = vector.load %arg6[%c0_106, %c0_107] : memref<128x128xbf16, #tpu.memory_space<vmem>>, vector<128x128xbf16>
      %cst_108 = arith.constant dense<0.000000e+00> : vector<16x128xf32>
      %126 = tpu.matmul %124, %125, %cst_108 {dimension_numbers = #tpu.dot_dimension_numbers<[1], [0], [0], [1], [0, 0, 1, 1], [], []>} : vector<16x128xbf16>, vector<128x128xbf16>, vector<16x128xf32> -> vector<16x128xf32>
      %c0_109 = arith.constant 0 : index
      %c0_110 = arith.constant 0 : index
      %127 = vector.load %arg7[%c0_109, %c0_110] : memref<128x128xbf16, #tpu.memory_space<vmem>>, vector<128x128xbf16>
      %cst_111 = arith.constant dense<0.000000e+00> : vector<16x128xf32>
      %128 = tpu.matmul %123, %127, %cst_111 {dimension_numbers = #tpu.dot_dimension_numbers<[1], [0], [0], [1], [0, 0, 1, 1], [], []>} : vector<16x128xbf16>, vector<128x128xbf16>, vector<16x128xf32> -> vector<16x128xf32>
      %129 = arith.addf %126, %128 : vector<16x128xf32>
      %c0_112 = arith.constant 0 : index
      %c0_113 = arith.constant 0 : index
      %130 = vector.load %arg8[%c0_112, %c0_113] : memref<1x128xf32, #tpu.memory_space<vmem>>, vector<1x128xf32>
      %131 = vector.broadcast %130 : vector<1x128xf32> to vector<16x128xf32>
      %132 = arith.addf %129, %131 : vector<16x128xf32>
      %cst_114 = arith.constant 0.000000e+00 : f32
      %133 = vector.broadcast %cst_114 : f32 to vector<16x128xf32>
      %134 = arith.maximumf %132, %133 : vector<16x128xf32>
      %c0_115 = arith.constant 0 : index
      %c0_116 = arith.constant 0 : index
      %135 = vector.load %arg9[%c0_115, %c0_116] : memref<16x128xf32, #tpu.memory_space<vmem>>, vector<16x128xf32>
      tpu.vector_store %arg9[%c0_115, %c0_116], %134 {strides = array<i32>} : memref<16x128xf32, #tpu.memory_space<vmem>>, vector<16x128xf32>,
    } else {
    }
    return
  }
  func.func @transform_0(%arg0: i32, %arg1: i32) -> (i32, i32, i32) {
    %c0_i32 = arith.constant 0 : i32
    %c0_i32_0 = arith.constant 0 : i32
    return %c0_i32, %arg0, %arg1 : i32, i32, i32
  }
  func.func @transform_1(%arg0: i32, %arg1: i32) -> (i32, i32) {
    %c0_i32 = arith.constant 0 : i32
    %c0_i32_0 = arith.constant 0 : i32
    return %arg1, %c0_i32 : i32, i32
  }
  func.func @transform_2(%arg0: i32, %arg1: i32) -> (i32, i32) {
    %c0_i32 = arith.constant 0 : i32
    %c0_i32_0 = arith.constant 0 : i32
    return %arg0, %c0_i32 : i32, i32
  }
  func.func @transform_3(%arg0: i32, %arg1: i32) -> (i32, i32, i32) {
    %c0_i32 = arith.constant 0 : i32
    %c0_i32_0 = arith.constant 0 : i32
    %c0_i32_1 = arith.constant 0 : i32
    %c0_i32_2 = arith.constant 0 : i32
    return %c0_i32, %c0_i32_0, %c0_i32_1 : i32, i32, i32
  }
  func.func @transform_4(%arg0: i32, %arg1: i32) -> (i32, i32) {
    %c0_i32 = arith.constant 0 : i32
    %c0_i32_0 = arith.constant 0 : i32
    %c0_i32_1 = arith.constant 0 : i32
    return %c0_i32, %c0_i32_0 : i32, i32
  }
  func.func @transform_5(%arg0: i32, %arg1: i32) -> (i32, i32) {
    %c0_i32 = arith.constant 0 : i32
    %c0_i32_0 = arith.constant 0 : i32
    %c0_i32_1 = arith.constant 0 : i32
    return %c0_i32, %c0_i32_0 : i32, i32
  }
  func.func @transform_6(%arg0: i32, %arg1: i32) -> (i32, i32) {
    %c0_i32 = arith.constant 0 : i32
    %c0_i32_0 = arith.constant 0 : i32
    %c0_i32_1 = arith.constant 0 : i32
    return %c0_i32, %c0_i32_0 : i32, i32
  }
  func.func @transform_7(%arg0: i32, %arg1: i32) -> (i32, i32) {
    %c0_i32 = arith.constant 0 : i32
    %c0_i32_0 = arith.constant 0 : i32
    return %arg0, %c0_i32 : i32, i32
  }
}

</mosaic_0001>

<bundles_post_ra>
// kernel: layer.2
= control target key start
LH: loop header
LB: loop body
LE: loop exit
PB: predicated region body
PF: predicated region fallthrough
CT: control target
= control target key end

     0   :  { %12 = vsyncpa [#allocation4], 0  ;;  %s2024_s24 = smov [#allocation3]   ;;  %s2410_s0 = inlined_call_operand.vmem [shape: bf16[6,16,128], index: 0, kind: input, shape index: {}]   ;;  %s2411_s1 = inlined_call_operand.vmem [shape: bf16[128,128], index: 1, kind: input, shape index: {}]   ;;  %s2412_s2 = inlined_call_operand.vmem [shape: bf16[16,128], index: 2, kind: input, shape index: {}]   ;;  %s2413_s3 = inlined_call_operand.hbm [shape: bf16[6,128,128], index: 3, kind: input, shape index: {}]   ;;  %s2414_s4 = inlined_call_operand.vmem [shape: bf16[128,128], index: 4, kind: input, shape index: {}]   ;;  %s2415_s5 = inlined_call_operand.vmem [shape: bf16[128,128], index: 5, kind: input, shape index: {}]   ;;  %s2416_s6 = inlined_call_operand.vmem [shape: f32[1,128], index: 6, kind: input, shape index: {}]   ;;  %s2417_s7 = inlined_call_operand.vmem [shape: f32[16,128], index: 7, kind: output, shape index: {}]  }
   0x1   :  { %s24_s25 = sshll.u32 %s2024_s24, 4  ;;  %s2000_s28 = scalar_lea.hbm %s2413_s3, 6144  ;;  %s25_s25 = int_to_ptr.vmem [resolvable:$true] %s24_s25 }
   0x2   :  { %p2001_p0 = scmp.ne.s32.totalorder %s2413_s3, %s2000_s28  ;;  %p2004_p1 = scmp.lt.u32.totalorder %s2000_s28, %s2413_s3 }
   0x4   :  { %p2006_p2 = pnand %p2004_p1, %p2001_p0 }
   0x6   :  { %2009 = shalt.err (!%p2006_p2)
}
   0x7   :  { %s2010_s10 = scalar_lea.vmem %s25_s25, 6144  ;;  %p2015_p4 = scmp.lt.s32.totalorder %s25_s25, %s25_s25 }
   0x8   :  { %p2011_p3 = scmp.ne.s32.totalorder %s25_s25, %s2010_s10  ;;  %p2016_p5 = scmp.lt.s32.totalorder %s2010_s10, %s2010_s10 }
   0xa   :  { %p2017_p6 = por %p2016_p5, %p2015_p4 }
   0xc   :  { %p2018_p7 = pnand %p2017_p6, %p2011_p3 }
   0xe   :  { %2021 = shalt.err (!%p2018_p7)
}
   0xf   :  { %s2025_s11 = smov 64   ;;  %s2026_s12 = smov 4  }
  0x10   :  { %30 = dma.hbm_to_vmem [thread:$0]  %s2413_s3, 6144, %s25_s25, [#allocation4], %s2025_s11, %s2025_s11, %s2026_s12  }
  0x11   :  { %2022 = dma.done.wait [#allocation4], 6144  }
  0x12   :  { %2023 = vsyncadd [#allocation4], 4294961152  ;;  %v2027_v0 = vmov 0.0   ;;  %vm2028_vm0 = vmmov 0   ;;  %v2091_v1 = vld [vmem:[%s2411_s1] sm:$0xff]   ;;  %v2097_v2 = vld [vmem:[%s2411_s1 + $0x8] sm:$0xff]  }
  0x13   :  { %1610 = vmatprep.subr.bf16.mxu1 %v2027_v0  ;;  %1626 = vmatprep.mubr.msk.bf16.mxu1 %vm2028_vm0, %v2027_v0  ;;  %v2106_v3 = vld [vmem:[%s2411_s1 + $0x10] sm:$0xff]   ;;  %v2115_v4 = vld [vmem:[%s2411_s1 + $0x18] sm:$0xff]   ;;  %v2123_v5 = vld [vmem:[%s2411_s1 + $0x20] sm:$0xff]   ;;  %v2029_v33 = vmov 32  }
  0x14   :  { %1690 = vmatprep.subr.bf16.mxu0 %v2027_v0  ;;  %1706 = vmatprep.mubr.msk.bf16.mxu0 %vm2028_vm0, %v2027_v0  ;;  %v2132_v6 = vld [vmem:[%s2411_s1 + $0x28] sm:$0xff]   ;;  %v2141_v7 = vld [vmem:[%s2411_s1 + $0x30] sm:$0xff]   ;;  %v2150_v8 = vld [vmem:[%s2411_s1 + $0x38] sm:$0xff]  }
  0x15   :  { %1611 = vmatpush3.bf16.msra.mxu1 %v2091_v1  ;;  %1691 = vmatpush3.bf16.msra.mxu0 %v2091_v1  ;;  %v1925_v9 = vld [vmem:[%s2410_s0] sm:$0xff]   ;;  %v1926_v11 = vld [vmem:[%s2410_s0 + $0x8] sm:$0xff]   ;;  %v1927_v12 = vld [vmem:[%s2410_s0 + $0x10] sm:$0xff]  }
  0x16   :  { %1612 = vmatprep.subr.bf16.mxu1 %v2027_v0  ;;  %1692 = vmatprep.subr.bf16.mxu0 %v2027_v0  ;;  %v1929_v10 = vld [vmem:[%s2410_s0 + $0x20] sm:$0xff]   ;;  %v1932_v14 = vld [vmem:[#allocation3 + $0x48] sm:$0xff]   ;;  %v1928_v15 = vld [vmem:[%s2410_s0 + $0x18] sm:$0xff]  }
  0x17   :  { %v1931_v13 = vld [vmem:[#allocation3 + $0x40] sm:$0xff]   ;;  %v1933_v16 = vld [vmem:[#allocation3 + $0x50] sm:$0xff]   ;;  %v1934_v17 = vld [vmem:[#allocation3 + $0x58] sm:$0xff]   ;;  %1916 = vset.pattern.permute.xlu0 %v2029_v33 }
  0x18   :  { %v1935_v18 = vld [vmem:[#allocation3 + $0x60] sm:$0xff]   ;;  %v1936_v19 = vld [vmem:[#allocation3 + $0x68] sm:$0xff]   ;;  %v1937_v20 = vld [vmem:[#allocation3 + $0x70] sm:$0xff]  }
  0x19   :  { %1613 = vmatpush3.bf16.msra.mxu1 %v2097_v2  ;;  %1693 = vmatpush3.bf16.msra.mxu0 %v2097_v2  ;;  %v1938_v21 = vld [vmem:[#allocation3 + $0x78] sm:$0xff]   ;;  %v1930_v22 = vld [vmem:[%s2410_s0 + $0x28] sm:$0xff]   ;;  %v1939_v38 = vld [vmem:[#allocation3] sm:$0xff]  }
  0x1a   :  { %1614 = vmatprep.subr.bf16.mxu1 %v2027_v0  ;;  %1694 = vmatprep.subr.bf16.mxu0 %v2027_v0  ;;  %v1940_v42 = vld [vmem:[#allocation3 + $0x8] sm:$0xff]   ;;  %v1941_v43 = vld [vmem:[#allocation3 + $0x10] sm:$0xff]   ;;  %v1942_v44 = vld [vmem:[#allocation3 + $0x18] sm:$0xff]  }
  0x1b   :  { %v1943_v45 = vld [vmem:[#allocation3 + $0x20] sm:$0xff]   ;;  %v1944_v46 = vld [vmem:[#allocation3 + $0x28] sm:$0xff]   ;;  %v1945_v47 = vld [vmem:[#allocation3 + $0x30] sm:$0xff]  }
  0x1c   :  { %v1946_v48 = vld [vmem:[#allocation3 + $0x38] sm:$0xff]   ;;  %v1947_v53 = vld [vmem:[#allocation3 + $0x80] sm:$0xff]   ;;  %v1948_v57 = vld [vmem:[#allocation3 + $0x88] sm:$0xff]  }
  0x1d   :  { %1615 = vmatpush3.bf16.msra.mxu1 %v2106_v3  ;;  %1695 = vmatpush3.bf16.msra.mxu0 %v2106_v3  ;;  %v1949_v58 = vld [vmem:[#allocation3 + $0x90] sm:$0xff]   ;;  %v1950_v59 = vld [vmem:[#allocation3 + $0x98] sm:$0xff]   ;;  %v1951_v60 = vld [vmem:[#allocation3 + $0xa0] sm:$0xff]  }
  0x1e   :  { %1616 = vmatprep.subr.bf16.mxu1 %v2027_v0  ;;  %1696 = vmatprep.subr.bf16.mxu0 %v2027_v0  ;;  %v1952_v61 = vld [vmem:[#allocation3 + $0xa8] sm:$0xff]   ;;  %v1953_v62 = vld [vmem:[#allocation3 + $0xb0] sm:$0xff]   ;;  %v1954_v63 = vld [vmem:[#allocation3 + $0xb8] sm:$0xff]  }
  0x1f   :  { %v1966_v33 = vld [vmem:[#allocation3 + $0x118] sm:$0xff]  }
  0x21   :  { %1617 = vmatpush3.bf16.msra.mxu1 %v2115_v4  ;;  %1697 = vmatpush3.bf16.msra.mxu0 %v2115_v4 }
  0x22   :  { %1618 = vmatprep.subr.bf16.mxu1 %v2027_v0  ;;  %1698 = vmatprep.subr.bf16.mxu0 %v2027_v0 }
  0x25   :  { %1619 = vmatpush3.bf16.msra.mxu1 %v2123_v5  ;;  %1699 = vmatpush3.bf16.msra.mxu0 %v2123_v5 }
  0x26   :  { %1620 = vmatprep.subr.bf16.mxu1 %v2027_v0  ;;  %1700 = vmatprep.subr.bf16.mxu0 %v2027_v0 }
  0x29   :  { %1621 = vmatpush3.bf16.msra.mxu1 %v2132_v6  ;;  %1701 = vmatpush3.bf16.msra.mxu0 %v2132_v6 }
  0x2a   :  { %1622 = vmatprep.subr.bf16.mxu1 %v2027_v0  ;;  %1702 = vmatprep.subr.bf16.mxu0 %v2027_v0 }
  0x2d   :  { %1623 = vmatpush3.bf16.msra.mxu1 %v2141_v7  ;;  %1703 = vmatpush3.bf16.msra.mxu0 %v2141_v7 }
  0x2e   :  { %1624 = vmatprep.subr.bf16.mxu1 %v2027_v0  ;;  %1704 = vmatprep.subr.bf16.mxu0 %v2027_v0 }
  0x31   :  { %1625 = vmatpush3.bf16.msra.mxu1 %v2150_v8  ;;  %1705 = vmatpush3.bf16.msra.mxu0 %v2150_v8 }
  0x32   :  { %1630 = vmatprep.subr.bf16.mxu1 %v2027_v0  ;;  %1730 = vmatprep.subr.bf16.mxu0 %v2027_v0 }
  0x34   :  { %1627 = vmatmul.mubr.bf16.vlgmr.msra.gmra.mrb[0].mxu1 %v1925_v9  ;;  %1707 = vmatmul.mubr.bf16.vlgmr.msra.gmra.mrb[0].mxu0 %v1929_v10 }
  0x35   :  { %1631 = vmatpush3.bf16.msra.mxu1 %v2091_v1  ;;  %1646 = vmatprep.mubr.msk.bf16.mxu1 %vm2028_vm0, %v2027_v0 }
  0x36   :  { %1632 = vmatprep.subr.bf16.mxu1 %v2027_v0  ;;  %1746 = vmatprep.mubr.msk.bf16.mxu0 %vm2028_vm0, %v2027_v0 }
  0x37   :  { %1731 = vmatpush3.bf16.msra.mxu0 %v1931_v13  ;;  %v1958_v13 = vld [vmem:[#allocation3 + $0xd8] sm:$0xff]  }
  0x38   :  { %1732 = vmatprep.subr.bf16.mxu0 %v2027_v0 }
  0x39   :  { %1633 = vmatpush3.bf16.msra.mxu1 %v2097_v2 }
  0x3a   :  { %1634 = vmatprep.subr.bf16.mxu1 %v2027_v0 }
  0x3b   :  { %1733 = vmatpush3.bf16.msra.mxu0 %v1932_v14  ;;  %v1959_v14 = vld [vmem:[#allocation3 + $0xe0] sm:$0xff]  }
  0x3c   :  { %1734 = vmatprep.subr.bf16.mxu0 %v2027_v0 }
  0x3d   :  { %1635 = vmatpush3.bf16.msra.mxu1 %v2106_v3 }
  0x3e   :  { %1636 = vmatprep.subr.bf16.mxu1 %v2027_v0 }
  0x3f   :  { %1735 = vmatpush3.bf16.msra.mxu0 %v1933_v16  ;;  %v1961_v16 = vld [vmem:[#allocation3 + $0xf0] sm:$0xff]  }
  0x40   :  { %1736 = vmatprep.subr.bf16.mxu0 %v2027_v0 }
  0x41   :  { %1637 = vmatpush3.bf16.msra.mxu1 %v2115_v4 }
  0x42   :  { %1638 = vmatprep.subr.bf16.mxu1 %v2027_v0 }
  0x43   :  { %1737 = vmatpush3.bf16.msra.mxu0 %v1934_v17  ;;  %v1962_v17 = vld [vmem:[#allocation3 + $0xf8] sm:$0xff]  }
  0x44   :  { %1738 = vmatprep.subr.bf16.mxu0 %v2027_v0 }
  0x45   :  { %1639 = vmatpush3.bf16.msra.mxu1 %v2123_v5 }
  0x46   :  { %1640 = vmatprep.subr.bf16.mxu1 %v2027_v0 }
  0x47   :  { %1739 = vmatpush3.bf16.msra.mxu0 %v1935_v18 }
  0x48   :  { %1740 = vmatprep.subr.bf16.mxu0 %v2027_v0 }
  0x49   :  { %1641 = vmatpush3.bf16.msra.mxu1 %v2132_v6 }
  0x4a   :  { %1642 = vmatprep.subr.bf16.mxu1 %v2027_v0 }
  0x4b   :  { %1741 = vmatpush3.bf16.msra.mxu0 %v1936_v19 }
  0x4c   :  { %1742 = vmatprep.subr.bf16.mxu0 %v2027_v0 }
  0x4d   :  { %1643 = vmatpush3.bf16.msra.mxu1 %v2141_v7 }
  0x4e   :  { %1644 = vmatprep.subr.bf16.mxu1 %v2027_v0 }
  0x4f   :  { %1743 = vmatpush3.bf16.msra.mxu0 %v1937_v20 }
  0x50   :  { %1744 = vmatprep.subr.bf16.mxu0 %v2027_v0 }
  0x51   :  { %1645 = vmatpush3.bf16.msra.mxu1 %v2150_v8 }
  0x52   :  { %1650 = vmatprep.subr.bf16.mxu1 %v2027_v0 }
  0x53   :  { %1745 = vmatpush3.bf16.msra.mxu0 %v1938_v21 }
  0x54   :  { %1647 = vmatmul.mubr.bf16.vlgmr.msra.gmra.mrb[4].mxu1 %v1926_v11  ;;  %1750 = vmatprep.subr.bf16.mxu0 %v2027_v0  ;;  %v1956_v11 = vld [vmem:[#allocation3 + $0xc8] sm:$0xff]  }
  0x55   :  { %1651 = vmatpush3.bf16.msra.mxu1 %v2091_v1  ;;  %1666 = vmatprep.mubr.msk.bf16.mxu1 %vm2028_vm0, %v2027_v0 }
  0x56   :  { %1652 = vmatprep.subr.bf16.mxu1 %v2027_v0 }
  0x59   :  { %1653 = vmatpush3.bf16.msra.mxu1 %v2097_v2 }
  0x5a   :  { %1654 = vmatprep.subr.bf16.mxu1 %v2027_v0 }
  0x5d   :  { %1655 = vmatpush3.bf16.msra.mxu1 %v2106_v3 }
  0x5e   :  { %1656 = vmatprep.subr.bf16.mxu1 %v2027_v0 }
  0x61   :  { %1657 = vmatpush3.bf16.msra.mxu1 %v2115_v4 }
  0x62   :  { %1658 = vmatprep.subr.bf16.mxu1 %v2027_v0 }
  0x65   :  { %1659 = vmatpush3.bf16.msra.mxu1 %v2123_v5 }
  0x66   :  { %1660 = vmatprep.subr.bf16.mxu1 %v2027_v0 }
  0x69   :  { %1661 = vmatpush3.bf16.msra.mxu1 %v2132_v6 }
  0x6a   :  { %1662 = vmatprep.subr.bf16.mxu1 %v2027_v0 }
  0x6d   :  { %1663 = vmatpush3.bf16.msra.mxu1 %v2141_v7 }
  0x6e   :  { %1664 = vmatprep.subr.bf16.mxu1 %v2027_v0 }
  0x71   :  { %1665 = vmatpush3.bf16.msra.mxu1 %v2150_v8 }
  0x72   :  { %1670 = vmatprep.subr.bf16.mxu1 %v2027_v0 }
  0x74   :  { %1667 = vmatmul.mubr.bf16.vlgmr.msra.gmra.mrb[8].mxu1 %v1927_v12  ;;  %v1957_v12 = vld [vmem:[#allocation3 + $0xd0] sm:$0xff]  }
  0x75   :  { %1671 = vmatpush3.bf16.msra.mxu1 %v2091_v1  ;;  %1686 = vmatprep.mubr.msk.bf16.mxu1 %vm2028_vm0, %v2027_v0 }
  0x76   :  { %1672 = vmatprep.subr.bf16.mxu1 %v2027_v0 }
  0x79   :  { %1673 = vmatpush3.bf16.msra.mxu1 %v2097_v2 }
  0x7a   :  { %1674 = vmatprep.subr.bf16.mxu1 %v2027_v0 }
  0x7d   :  { %1675 = vmatpush3.bf16.msra.mxu1 %v2106_v3 }
  0x7e   :  { %1676 = vmatprep.subr.bf16.mxu1 %v2027_v0 }
  0x81   :  { %1677 = vmatpush3.bf16.msra.mxu1 %v2115_v4 }
  0x82   :  { %1678 = vmatprep.subr.bf16.mxu1 %v2027_v0 }
  0x85   :  { %1679 = vmatpush3.bf16.msra.mxu1 %v2123_v5 }
  0x86   :  { %1680 = vmatprep.subr.bf16.mxu1 %v2027_v0 }
  0x89   :  { %1681 = vmatpush3.bf16.msra.mxu1 %v2132_v6 }
  0x8a   :  { %1682 = vmatprep.subr.bf16.mxu1 %v2027_v0 }
  0x8d   :  { %1683 = vmatpush3.bf16.msra.mxu1 %v2141_v7 }
  0x8e   :  { %1684 = vmatprep.subr.bf16.mxu1 %v2027_v0 }
  0x91   :  { %1685 = vmatpush3.bf16.msra.mxu1 %v2150_v8 }
  0x92   :  { %1710 = vmatprep.subr.bf16.mxu1 %v2027_v0 }
  0x94   :  { %1687 = vmatmul.mubr.bf16.vlgmr.msra.gmra.mrb[12].mxu1 %v1928_v15  ;;  %v1960_v15 = vld [vmem:[#allocation3 + $0xe8] sm:$0xff]  }
  0x95   :  { %1711 = vmatpush3.bf16.msra.mxu1 %v2091_v1  ;;  %1726 = vmatprep.mubr.msk.bf16.mxu1 %vm2028_vm0, %v2027_v0 }
  0x96   :  { %1712 = vmatprep.subr.bf16.mxu1 %v2027_v0 }
  0x99   :  { %1713 = vmatpush3.bf16.msra.mxu1 %v2097_v2 }
  0x9a   :  { %1714 = vmatprep.subr.bf16.mxu1 %v2027_v0 }
  0x9d   :  { %1715 = vmatpush3.bf16.msra.mxu1 %v2106_v3 }
  0x9e   :  { %1716 = vmatprep.subr.bf16.mxu1 %v2027_v0 }
  0xa1   :  { %1717 = vmatpush3.bf16.msra.mxu1 %v2115_v4 }
  0xa2   :  { %1718 = vmatprep.subr.bf16.mxu1 %v2027_v0 }
  0xa5   :  { %1719 = vmatpush3.bf16.msra.mxu1 %v2123_v5  ;;  %v1955_v5 = vld [vmem:[#allocation3 + $0xc0] sm:$0xff]  }
  0xa6   :  { %1720 = vmatprep.subr.bf16.mxu1 %v2027_v0 }
  0xa9   :  { %1721 = vmatpush3.bf16.msra.mxu1 %v2132_v6 }
  0xaa   :  { %1722 = vmatprep.subr.bf16.mxu1 %v2027_v0 }
  0xad   :  { %1723 = vmatpush3.bf16.msra.mxu1 %v2141_v7 }
  0xae   :  { %1724 = vmatprep.subr.bf16.mxu1 %v2027_v0 }
  0xb1   :  { %1725 = vmatpush3.bf16.msra.mxu1 %v2150_v8 }
  0xb2   :  { %1850 = vmatprep.subr.bf16.mxu1 %v2027_v0 }
  0xb4   :  { %1727 = vmatmul.mubr.bf16.vlgmr.msra.gmra.mrb[16].mxu1 %v1930_v22  ;;  %v1963_v22 = vld [vmem:[#allocation3 + $0x100] sm:$0xff]  }
  0xb5   :  { %1866 = vmatprep.mubr.msk.bf16.mxu1 %vm2028_vm0, %v2027_v0 }
 0x107   :  { %v165_v23 = vpop.f32.mrb[0].mxu1  ;;  %v2262_v24 = vpop.f32.mrb[0].mxu0 }
 0x108   :  { %v1628_v25 = vpop.f32.mrb[1].mxu1  ;;  %v1708_v26 = vpop.f32.mrb[1].mxu0 }
 0x109   :  { %v168_v27 = vpop.f32.mrb[2].mxu1  ;;  %v2264_v28 = vpop.f32.mrb[2].mxu0 }
 0x10a   :  { %v466_v29 = vpack.c.bf16 %v168_v27, %v165_v23  ;;  %v1629_v30 = vpop.f32.mrb[3].mxu1  ;;  %v913_v31 = vpack.c.bf16 %v2264_v28, %v2262_v24  ;;  %v1709_v32 = vpop.f32.mrb[3].mxu0 }
 0x10b   :  { %v1964_v30 = vld [vmem:[#allocation3 + $0x108] sm:$0xff]   ;;  %v1965_v32 = vld [vmem:[#allocation3 + $0x110] sm:$0xff]  }
 0x127   :  { %v222_v34 = vpop.f32.mrb[4].mxu1 }
 0x128   :  { %v485_v35 = vadd.f32 %v222_v34, %v165_v23  ;;  %v1648_v36 = vpop.f32.mrb[5].mxu1 }
 0x129   :  { %v225_v37 = vpop.f32.mrb[6].mxu1 }
 0x12a   :  { %v486_v39 = vadd.f32 %v225_v37, %v168_v27  ;;  %v487_v40 = vpack.c.bf16 %v225_v37, %v222_v34  ;;  %v1649_v41 = vpop.f32.mrb[7].mxu1  ;;  %v1967_v37 = vld [vmem:[#allocation3 + $0x120] sm:$0xff]  }
 0x12b   :  { %v1980_v41 = vld [vmem:[%s2415_s5 + $0x8] sm:$0xff]  }
 0x12c   :  { %1747 = vmatmul.mubr.bf16.vlgmr.msra.gmra.mrb[4].mxu0 %v487_v40  ;;  %v1968_v40 = vld [vmem:[#allocation3 + $0x128] sm:$0xff]  }
 0x12d   :  { %1751 = vmatpush3.bf16.msra.mxu0 %v1939_v38  ;;  %1766 = vmatprep.mubr.msk.bf16.mxu0 %vm2028_vm0, %v2027_v0 }
 0x12e   :  { %1752 = vmatprep.subr.bf16.mxu0 %v2027_v0 }
 0x131   :  { %1753 = vmatpush3.bf16.msra.mxu0 %v1940_v42  ;;  %v1969_v42 = vld [vmem:[#allocation3 + $0x130] sm:$0xff]  }
 0x132   :  { %1754 = vmatprep.subr.bf16.mxu0 %v2027_v0 }
 0x135   :  { %1755 = vmatpush3.bf16.msra.mxu0 %v1941_v43  ;;  %v1981_v43 = vld [vmem:[%s2415_s5 + $0x10] sm:$0xff]  }
 0x136   :  { %1756 = vmatprep.subr.bf16.mxu0 %v2027_v0 }
 0x139   :  { %1757 = vmatpush3.bf16.msra.mxu0 %v1942_v44  ;;  %v1970_v44 = vld [vmem:[#allocation3 + $0x138] sm:$0xff]  }
 0x13a   :  { %1758 = vmatprep.subr.bf16.mxu0 %v2027_v0 }
 0x13d   :  { %1759 = vmatpush3.bf16.msra.mxu0 %v1943_v45  ;;  %v1982_v45 = vld [vmem:[%s2415_s5 + $0x18] sm:$0xff]  }
 0x13e   :  { %1760 = vmatprep.subr.bf16.mxu0 %v2027_v0 }
 0x141   :  { %1761 = vmatpush3.bf16.msra.mxu0 %v1944_v46  ;;  %v1971_v46 = vld [vmem:[#allocation3 + $0x140] sm:$0xff]  }
 0x142   :  { %1762 = vmatprep.subr.bf16.mxu0 %v2027_v0 }
 0x145   :  { %1763 = vmatpush3.bf16.msra.mxu0 %v1945_v47  ;;  %v1983_v47 = vld [vmem:[%s2415_s5 + $0x20] sm:$0xff]  }
 0x146   :  { %1764 = vmatprep.subr.bf16.mxu0 %v2027_v0 }
 0x147   :  { %v279_v49 = vpop.f32.mrb[8].mxu1 }
 0x148   :  { %v685_v50 = vadd.f32 %v485_v35, %v279_v49  ;;  %v1668_v51 = vpop.f32.mrb[9].mxu1 }
 0x149   :  { %1765 = vmatpush3.bf16.msra.mxu0 %v1946_v48  ;;  %v282_v52 = vpop.f32.mrb[10].mxu1  ;;  %v1972_v48 = vld [vmem:[#allocation3 + $0x148] sm:$0xff]  }
 0x14a   :  { %v686_v54 = vadd.f32 %v486_v39, %v282_v52  ;;  %v687_v55 = vpack.c.bf16 %v282_v52, %v279_v49  ;;  %1770 = vmatprep.subr.bf16.mxu0 %v2027_v0  ;;  %v1669_v56 = vpop.f32.mrb[11].mxu1  ;;  %v1979_v39 = vld [vmem:[%s2415_s5] sm:$0xff]   ;;  %v1984_v49 = vld [vmem:[%s2415_s5 + $0x28] sm:$0xff]   ;;  %v1977_v52 = vld [vmem:[#allocation3 + $0x170] sm:$0xff]  }
 0x14b   :  { %1851 = vmatpush3.bf16.msra.mxu1 %v1979_v39  ;;  %v1976_v51 = vld [vmem:[#allocation3 + $0x168] sm:$0xff]  }
 0x14c   :  { %1767 = vmatmul.mubr.bf16.vlgmr.msra.gmra.mrb[4].mxu0 %v466_v29  ;;  %1852 = vmatprep.subr.bf16.mxu1 %v2027_v0 }
 0x14d   :  { %1771 = vmatpush3.bf16.msra.mxu0 %v1947_v53  ;;  %1786 = vmatprep.mubr.msk.bf16.mxu0 %vm2028_vm0, %v2027_v0  ;;  %v1978_v53 = vld [vmem:[#allocation3 + $0x178] sm:$0xff]  }
 0x14e   :  { %1772 = vmatprep.subr.bf16.mxu0 %v2027_v0 }
 0x14f   :  { %1853 = vmatpush3.bf16.msra.mxu1 %v1980_v41 }
 0x150   :  { %1854 = vmatprep.subr.bf16.mxu1 %v2027_v0 }
 0x151   :  { %1773 = vmatpush3.bf16.msra.mxu0 %v1948_v57 }
 0x152   :  { %1774 = vmatprep.subr.bf16.mxu0 %v2027_v0 }
 0x153   :  { %1855 = vmatpush3.bf16.msra.mxu1 %v1981_v43 }
 0x154   :  { %1856 = vmatprep.subr.bf16.mxu1 %v2027_v0 }
 0x155   :  { %1775 = vmatpush3.bf16.msra.mxu0 %v1949_v58 }
 0x156   :  { %1776 = vmatprep.subr.bf16.mxu0 %v2027_v0 }
 0x157   :  { %1857 = vmatpush3.bf16.msra.mxu1 %v1982_v45 }
 0x158   :  { %1858 = vmatprep.subr.bf16.mxu1 %v2027_v0 }
 0x159   :  { %1777 = vmatpush3.bf16.msra.mxu0 %v1950_v59 }
 0x15a   :  { %1778 = vmatprep.subr.bf16.mxu0 %v2027_v0 }
 0x15b   :  { %1859 = vmatpush3.bf16.msra.mxu1 %v1983_v47 }
 0x15c   :  { %1860 = vmatprep.subr.bf16.mxu1 %v2027_v0 }
 0x15d   :  { %1779 = vmatpush3.bf16.msra.mxu0 %v1951_v60 }
 0x15e   :  { %1780 = vmatprep.subr.bf16.mxu0 %v2027_v0 }
 0x15f   :  { %1861 = vmatpush3.bf16.msra.mxu1 %v1984_v49 }
 0x160   :  { %1862 = vmatprep.subr.bf16.mxu1 %v2027_v0 }
 0x161   :  { %1781 = vmatpush3.bf16.msra.mxu0 %v1952_v61 }
 0x162   :  { %1782 = vmatprep.subr.bf16.mxu0 %v2027_v0 }
 0x165   :  { %1783 = vmatpush3.bf16.msra.mxu0 %v1953_v62 }
 0x166   :  { %1784 = vmatprep.subr.bf16.mxu0 %v2027_v0 }
 0x167   :  { %v336_v1 = vpop.f32.mrb[12].mxu1 }
 0x168   :  { %v798_v2 = vadd.f32 %v685_v50, %v336_v1  ;;  %v1688_v3 = vpop.f32.mrb[13].mxu1  ;;  %v1973_v50 = vld [vmem:[#allocation3 + $0x150] sm:$0xff]  }
 0x169   :  { %1785 = vmatpush3.bf16.msra.mxu0 %v1954_v63  ;;  %v339_v4 = vpop.f32.mrb[14].mxu1  ;;  %v1987_v63 = vld [vmem:[%s2414_s4] sm:$0xff]   ;;  %v1989_v3 = vld [vmem:[%s2414_s4 + $0x10] sm:$0xff]  }
 0x16a   :  { %v799_v6 = vadd.f32 %v686_v54, %v339_v4  ;;  %v800_v7 = vpack.c.bf16 %v339_v4, %v336_v1  ;;  %v911_v8 = vadd.f32 %v798_v2, %v2262_v24  ;;  %1790 = vmatprep.subr.bf16.mxu0 %v2027_v0  ;;  %v1689_v9 = vpop.f32.mrb[15].mxu1  ;;  %v1985_v24 = vld [vmem:[%s2415_s5 + $0x30] sm:$0xff]   ;;  %v1986_v54 = vld [vmem:[%s2415_s5 + $0x38] sm:$0xff]   ;;  %v1988_v2 = vld [vmem:[%s2414_s4 + $0x8] sm:$0xff]  }
 0x16b   :  { %1863 = vmatpush3.bf16.msra.mxu1 %v1985_v24  ;;  %v1990_v4 = vld [vmem:[%s2414_s4 + $0x18] sm:$0xff]   ;;  %v1995_v9 = vld [vmem:[%s2412_s2] sm:$0xff]  }
 0x16c   :  { %v912_v10 = vadd.f32 %v799_v6, %v2264_v28  ;;  %1787 = vmatmul.mubr.bf16.vlgmr.msra.gmra.mrb[4].mxu0 %v687_v55  ;;  %v1974_v28 = vld [vmem:[#allocation3 + $0x158] sm:$0xff]   ;;  %1864 = vmatprep.subr.bf16.mxu1 %v2027_v0  ;;  %v1992_v6 = vld [vmem:[%s2414_s4 + $0x28] sm:$0xff]  }
 0x16d   :  { %1791 = vmatpush3.bf16.msra.mxu0 %v1955_v5  ;;  %1806 = vmatprep.mubr.msk.bf16.mxu0 %vm2028_vm0, %v2027_v0  ;;  %v1991_v5 = vld [vmem:[%s2414_s4 + $0x20] sm:$0xff]  }
 0x16e   :  { %1792 = vmatprep.subr.bf16.mxu0 %v2027_v0 }
 0x16f   :  { %1865 = vmatpush3.bf16.msra.mxu1 %v1986_v54 }
 0x170   :  { %1870 = vmatprep.subr.bf16.mxu1 %v2027_v0 }
 0x171   :  { %1793 = vmatpush3.bf16.msra.mxu0 %v1956_v11 }
 0x172   :  { %1794 = vmatprep.subr.bf16.mxu0 %v2027_v0 }
 0x175   :  { %1795 = vmatpush3.bf16.msra.mxu0 %v1957_v12 }
 0x176   :  { %1796 = vmatprep.subr.bf16.mxu0 %v2027_v0 }
 0x179   :  { %1797 = vmatpush3.bf16.msra.mxu0 %v1958_v13 }
 0x17a   :  { %1798 = vmatprep.subr.bf16.mxu0 %v2027_v0 }
 0x17d   :  { %1799 = vmatpush3.bf16.msra.mxu0 %v1959_v14 }
 0x17e   :  { %1800 = vmatprep.subr.bf16.mxu0 %v2027_v0 }
 0x181   :  { %1801 = vmatpush3.bf16.msra.mxu0 %v1960_v15  ;;  %v1483_v15 = vld [vmem:[%s2416_s6] ss:$0 sm:$0xff] }
 0x182   :  { %1802 = vmatprep.subr.bf16.mxu0 %v2027_v0 }
 0x185   :  { %1803 = vmatpush3.bf16.msra.mxu0 %v1961_v16 }
 0x186   :  { %1804 = vmatprep.subr.bf16.mxu0 %v2027_v0 }
 0x187   :  { %v2299_v18 = vpop.f32.mrb[16].mxu1 }
 0x188   :  { %v1024_v19 = vadd.f32 %v911_v8, %v2299_v18  ;;  %v1728_v20 = vpop.f32.mrb[17].mxu1  ;;  %v1994_v8 = vld [vmem:[%s2414_s4 + $0x38] sm:$0xff]  }
 0x189   :  { %1805 = vmatpush3.bf16.msra.mxu0 %v1962_v17  ;;  %v2302_v21 = vpop.f32.mrb[18].mxu1 }
 0x18a   :  { %v1137_v23 = vmax.f32 %v1024_v19, 1.0  ;;  %v1025_v25 = vadd.f32 %v912_v10, %v2302_v21  ;;  %v1026_v26 = vpack.c.bf16 %v2302_v21, %v2299_v18  ;;  %1810 = vmatprep.subr.bf16.mxu0 %v2027_v0  ;;  %v1729_v27 = vpop.f32.mrb[19].mxu1  ;;  %vm1135_vm1 = vcmp.gt.f32.partialorder %v1024_v19, 0.5 }
 0x18c   :  { %1996 = vrcp.f32 %v1137_v23  ;;  %v1138_v29 = vmax.f32 %v1025_v25, 1.0  ;;  %1807 = vmatmul.mubr.bf16.vlgmr.msra.gmra.mrb[4].mxu0 %v800_v7  ;;  %vm1136_vm2 = vcmp.gt.f32.partialorder %v1025_v25, 0.5  ;;  %v1993_v7 = vld [vmem:[%s2414_s4 + $0x30] sm:$0xff]  }
 0x18d   :  { %1811 = vmatpush3.bf16.msra.mxu0 %v1963_v22  ;;  %1826 = vmatprep.mubr.msk.bf16.mxu0 %vm2028_vm0, %v2027_v0 }
 0x18e   :  { %1998 = vrcp.f32 %v1138_v29  ;;  %1812 = vmatprep.subr.bf16.mxu0 %v2027_v0 }
 0x191   :  { %1813 = vmatpush3.bf16.msra.mxu0 %v1964_v30 }
 0x192   :  { %1814 = vmatprep.subr.bf16.mxu0 %v2027_v0 }
 0x195   :  { %1815 = vmatpush3.bf16.msra.mxu0 %v1965_v32 }
 0x196   :  { %v1997_v34 = vpop.eup %1996  ;;  %1816 = vmatprep.subr.bf16.mxu0 %v2027_v0 }
 0x197   :  { %v1143_v35 = vsel %vm1135_vm1, %v1997_v34, 0.0 }
 0x198   :  { %v1999_v36 = vpop.eup %1998  ;;  %1147 = vperm.xlu0 %1916, %v1143_v35  }
 0x199   :  { %1817 = vmatpush3.bf16.msra.mxu0 %v1966_v33  ;;  %v1144_v38 = vsel %vm1136_vm2, %v1999_v36, 0.0 }
 0x19a   :  { %1818 = vmatprep.subr.bf16.mxu0 %v2027_v0 }
 0x19c   :  { %1152 = vperm.xlu0 %1916, %v1144_v38  }
 0x19d   :  { %1819 = vmatpush3.bf16.msra.mxu0 %v1967_v37 }
 0x19e   :  { %1820 = vmatprep.subr.bf16.mxu0 %v2027_v0 }
 0x1a1   :  { %1821 = vmatpush3.bf16.msra.mxu0 %v1968_v40 }
 0x1a2   :  { %1822 = vmatprep.subr.bf16.mxu0 %v2027_v0 }
 0x1a5   :  { %1823 = vmatpush3.bf16.msra.mxu0 %v1969_v42 }
 0x1a6   :  { %1824 = vmatprep.subr.bf16.mxu0 %v2027_v0 }
 0x1a9   :  { %1825 = vmatpush3.bf16.msra.mxu0 %v1970_v44 }
 0x1aa   :  { %1830 = vmatprep.subr.bf16.mxu0 %v2027_v0 }
 0x1ac   :  { %1827 = vmatmul.mubr.bf16.vlgmr.msra.gmra.mrb[4].mxu0 %v913_v31  ;;  %v1975_v31 = vld [vmem:[#allocation3 + $0x160] sm:$0xff]  }
 0x1ad   :  { %1831 = vmatpush3.bf16.msra.mxu0 %v1971_v46  ;;  %1846 = vmatprep.mubr.msk.bf16.mxu0 %vm2028_vm0, %v2027_v0 }
 0x1ae   :  { %1832 = vmatprep.subr.bf16.mxu0 %v2027_v0 }
 0x1b1   :  { %1833 = vmatpush3.bf16.msra.mxu0 %v1972_v48 }
 0x1b2   :  { %1834 = vmatprep.subr.bf16.mxu0 %v2027_v0 }
 0x1b5   :  { %1835 = vmatpush3.bf16.msra.mxu0 %v1973_v50 }
 0x1b6   :  { %1836 = vmatprep.subr.bf16.mxu0 %v2027_v0 }
 0x1b9   :  { %1837 = vmatpush3.bf16.msra.mxu0 %v1974_v28 }
 0x1ba   :  { %1838 = vmatprep.subr.bf16.mxu0 %v2027_v0 }
 0x1bd   :  { %1839 = vmatpush3.bf16.msra.mxu0 %v1975_v31 }
 0x1be   :  { %1840 = vmatprep.subr.bf16.mxu0 %v2027_v0 }
 0x1c1   :  { %1841 = vmatpush3.bf16.msra.mxu0 %v1976_v51 }
 0x1c2   :  { %1842 = vmatprep.subr.bf16.mxu0 %v2027_v0 }
 0x1c5   :  { %1843 = vmatpush3.bf16.msra.mxu0 %v1977_v52 }
 0x1c6   :  { %1844 = vmatprep.subr.bf16.mxu0 %v2027_v0 }
 0x1c9   :  { %1845 = vmatpush3.bf16.msra.mxu0 %v1978_v53 }
 0x1cc   :  { %1847 = vmatmul.mubr.bf16.vlgmr.msra.gmra.mrb[4].mxu0 %v1026_v26 }
 0x217   :  { %v1148_v55 = vpop.permute.xlu0 %1147 }
 0x21b   :  { %v1153_v58 = vpop.permute.xlu0 %1152 }
 0x29f   :  { %v1126_v56 = vpop.f32.mrb[4].mxu0 }
 0x2a0   :  { %v1848_v57 = vpop.f32.mrb[5].mxu0  ;;  %v1155_v60 = vmul.f32 %v1148_v55, %v1126_v56 }
 0x2a1   :  { %v1129_v59 = vpop.f32.mrb[6].mxu0 }
 0x2a2   :  { %v1156_v61 = vmul.f32 %v1153_v58, %v1129_v59  ;;  %v1849_v62 = vpop.f32.mrb[7].mxu0 }
 0x2a4   :  { %v1157_v1 = vpack.c.bf16 %v1156_v61, %v1155_v60 }
 0x2a6   :  { %1867 = vmatmul.mubr.bf16.vlgmr.msra.gmra.mrb[20].mxu1 %v1157_v1 }
 0x2a7   :  { %1871 = vmatpush3.bf16.msra.mxu1 %v1987_v63  ;;  %1886 = vmatprep.mubr.msk.bf16.mxu1 %vm2028_vm0, %v2027_v0 }
 0x2a8   :  { %1872 = vmatprep.subr.bf16.mxu1 %v2027_v0 }
 0x2ab   :  { %1873 = vmatpush3.bf16.msra.mxu1 %v1988_v2 }
 0x2ac   :  { %1874 = vmatprep.subr.bf16.mxu1 %v2027_v0 }
 0x2af   :  { %1875 = vmatpush3.bf16.msra.mxu1 %v1989_v3 }
 0x2b0   :  { %1876 = vmatprep.subr.bf16.mxu1 %v2027_v0 }
 0x2b3   :  { %1877 = vmatpush3.bf16.msra.mxu1 %v1990_v4 }
 0x2b4   :  { %1878 = vmatprep.subr.bf16.mxu1 %v2027_v0 }
 0x2b7   :  { %1879 = vmatpush3.bf16.msra.mxu1 %v1991_v5 }
 0x2b8   :  { %1880 = vmatprep.subr.bf16.mxu1 %v2027_v0 }
 0x2bb   :  { %1881 = vmatpush3.bf16.msra.mxu1 %v1992_v6 }
 0x2bc   :  { %1882 = vmatprep.subr.bf16.mxu1 %v2027_v0 }
 0x2bf   :  { %1883 = vmatpush3.bf16.msra.mxu1 %v1993_v7 }
 0x2c0   :  { %1884 = vmatprep.subr.bf16.mxu1 %v2027_v0 }
 0x2c3   :  { %1885 = vmatpush3.bf16.msra.mxu1 %v1994_v8 }
 0x2c6   :  { %1887 = vmatmul.mubr.bf16.vlgmr.msra.gmra.mrb[24].mxu1 %v1995_v9 }
 0x379   :  { %v1274_v10 = vpop.f32.mrb[20].mxu1 }
 0x37a   :  { %v1868_v11 = vpop.f32.mrb[21].mxu1 }
 0x37b   :  { %v1277_v12 = vpop.f32.mrb[22].mxu1 }
 0x37c   :  { %v1869_v13 = vpop.f32.mrb[23].mxu1 }
 0x399   :  { %v1369_v14 = vpop.f32.mrb[24].mxu1 }
 0x39a   :  { %v1370_v16 = vadd.f32 %v1369_v14, %v1274_v10  ;;  %v1888_v17 = vpop.f32.mrb[25].mxu1 }
 0x39b   :  { %v1372_v18 = vpop.f32.mrb[26].mxu1 }
 0x39c   :  { %v1383_v19 = vadd.f32 %v1483_v15, %v1370_v16  ;;  %v1373_v0 = vadd.f32 %v1372_v18, %v1277_v12  ;;  %v1889_v20 = vpop.f32.mrb[27].mxu1 }
 0x39e   :  { %v1385_v21 = vmax.f32 %v1383_v19, 0.0  ;;  %v1384_v22 = vadd.f32 %v1483_v15, %v1373_v0 }
 0x3a0   :  { %1387 = vst [vmem:[%s2417_s7] sm:$0xff] %v1385_v21  ;;  %v1386_v23 = vmax.f32 %v1384_v22, 0.0 }
 0x3a2   :  { %1388 = vst [vmem:[%s2417_s7 + $0x8] sm:$0xff] %v1386_v23 }
 0x3a3   :  { %1393 = vsyncpa [#allocation4], 1 }

// kernel: layer.3
= control target key start
LH: loop header
LB: loop body
LE: loop exit
PB: predicated region body
PF: predicated region fallthrough
CT: control target
= control target key end

     0   :  { %v2102_v1 = vmov 0.0   ;;  %vm2103_vm0 = vmmov 0   ;;  %s2626_s0 = inlined_call_operand.vmem [shape: bf16[6,16,128], index: 0, kind: input, shape index: {}]   ;;  %s2627_s1 = inlined_call_operand.vmem [shape: bf16[128,128], index: 1, kind: input, shape index: {}]   ;;  %s2628_s2 = inlined_call_operand.vmem [shape: bf16[16,128], index: 2, kind: input, shape index: {}]   ;;  %s2629_s3 = inlined_call_operand.vmem [shape: bf16[6,128,128], index: 3, kind: input, shape index: {}]   ;;  %s2630_s4 = inlined_call_operand.vmem [shape: bf16[128,128], index: 4, kind: input, shape index: {}]   ;;  %s2631_s5 = inlined_call_operand.vmem [shape: bf16[128,128], index: 5, kind: input, shape index: {}]   ;;  %s2632_s6 = inlined_call_operand.vmem [shape: f32[1,128], index: 6, kind: input, shape index: {}]   ;;  %s2633_s7 = inlined_call_operand.hbm [shape: f32[16,128], index: 7, kind: output, shape index: {}]  }
   0x1   :  { %v2151_v0 = vld [vmem:[%s2627_s1] sm:$0xff]   ;;  %1688 = vmatprep.subr.bf16.mxu1 %v2102_v1  ;;  %1768 = vmatprep.subr.bf16.mxu0 %v2102_v1  ;;  %v2159_v2 = vld [vmem:[%s2627_s1 + $0x8] sm:$0xff]   ;;  %v2172_v3 = vld [vmem:[%s2627_s1 + $0x10] sm:$0xff]  }
   0x2   :  { %1689 = vmatpush3.bf16.msra.mxu1 %v2151_v0  ;;  %1704 = vmatprep.mubr.msk.bf16.mxu1 %vm2103_vm0, %v2102_v1  ;;  %v2181_v4 = vld [vmem:[%s2627_s1 + $0x18] sm:$0xff]   ;;  %v2188_v5 = vld [vmem:[%s2627_s1 + $0x20] sm:$0xff]   ;;  %v2197_v6 = vld [vmem:[%s2627_s1 + $0x28] sm:$0xff]  }
   0x3   :  { %1690 = vmatprep.subr.bf16.mxu1 %v2102_v1  ;;  %1769 = vmatpush3.bf16.msra.mxu0 %v2151_v0  ;;  %v2206_v7 = vld [vmem:[%s2627_s1 + $0x30] sm:$0xff]   ;;  %v2215_v8 = vld [vmem:[%s2627_s1 + $0x38] sm:$0xff]   ;;  %v2003_v9 = vld [vmem:[%s2626_s0] sm:$0xff]  }
   0x4   :  { %1770 = vmatprep.subr.bf16.mxu0 %v2102_v1  ;;  %1784 = vmatprep.mubr.msk.bf16.mxu0 %vm2103_vm0, %v2102_v1  ;;  %v2007_v10 = vld [vmem:[%s2626_s0 + $0x20] sm:$0xff]  }
   0x6   :  { %1691 = vmatpush3.bf16.msra.mxu1 %v2159_v2 }
   0x7   :  { %1692 = vmatprep.subr.bf16.mxu1 %v2102_v1  ;;  %1771 = vmatpush3.bf16.msra.mxu0 %v2159_v2 }
   0x8   :  { %1772 = vmatprep.subr.bf16.mxu0 %v2102_v1 }
   0xa   :  { %1693 = vmatpush3.bf16.msra.mxu1 %v2172_v3 }
   0xb   :  { %1694 = vmatprep.subr.bf16.mxu1 %v2102_v1  ;;  %1773 = vmatpush3.bf16.msra.mxu0 %v2172_v3 }
   0xc   :  { %1774 = vmatprep.subr.bf16.mxu0 %v2102_v1 }
   0xe   :  { %1695 = vmatpush3.bf16.msra.mxu1 %v2181_v4 }
   0xf   :  { %1696 = vmatprep.subr.bf16.mxu1 %v2102_v1  ;;  %1775 = vmatpush3.bf16.msra.mxu0 %v2181_v4 }
  0x10   :  { %1776 = vmatprep.subr.bf16.mxu0 %v2102_v1 }
  0x12   :  { %1697 = vmatpush3.bf16.msra.mxu1 %v2188_v5 }
  0x13   :  { %1698 = vmatprep.subr.bf16.mxu1 %v2102_v1  ;;  %1777 = vmatpush3.bf16.msra.mxu0 %v2188_v5 }
  0x14   :  { %1778 = vmatprep.subr.bf16.mxu0 %v2102_v1 }
  0x16   :  { %1699 = vmatpush3.bf16.msra.mxu1 %v2197_v6 }
  0x17   :  { %1700 = vmatprep.subr.bf16.mxu1 %v2102_v1  ;;  %1779 = vmatpush3.bf16.msra.mxu0 %v2197_v6 }
  0x18   :  { %1780 = vmatprep.subr.bf16.mxu0 %v2102_v1 }
  0x1a   :  { %1701 = vmatpush3.bf16.msra.mxu1 %v2206_v7 }
  0x1b   :  { %1702 = vmatprep.subr.bf16.mxu1 %v2102_v1  ;;  %1781 = vmatpush3.bf16.msra.mxu0 %v2206_v7 }
  0x1c   :  { %1782 = vmatprep.subr.bf16.mxu0 %v2102_v1 }
  0x1e   :  { %1703 = vmatpush3.bf16.msra.mxu1 %v2215_v8 }
  0x1f   :  { %1708 = vmatprep.subr.bf16.mxu1 %v2102_v1  ;;  %1783 = vmatpush3.bf16.msra.mxu0 %v2215_v8 }
  0x20   :  { %1808 = vmatprep.subr.bf16.mxu0 %v2102_v1 }
  0x21   :  { %1705 = vmatmul.mubr.bf16.vlgmr.msra.gmra.mrb[0].mxu1 %v2003_v9 }
  0x22   :  { %1709 = vmatpush3.bf16.msra.mxu1 %v2151_v0  ;;  %1724 = vmatprep.mubr.msk.bf16.mxu1 %vm2103_vm0, %v2102_v1 }
  0x23   :  { %1710 = vmatprep.subr.bf16.mxu1 %v2102_v1  ;;  %1785 = vmatmul.mubr.bf16.vlgmr.msra.gmra.mrb[0].mxu0 %v2007_v10 }
  0x24   :  { %1824 = vmatprep.mubr.msk.bf16.mxu0 %vm2103_vm0, %v2102_v1 }
  0x26   :  { %1711 = vmatpush3.bf16.msra.mxu1 %v2159_v2 }
  0x27   :  { %1712 = vmatprep.subr.bf16.mxu1 %v2102_v1 }
  0x2a   :  { %1713 = vmatpush3.bf16.msra.mxu1 %v2172_v3 }
  0x2b   :  { %1714 = vmatprep.subr.bf16.mxu1 %v2102_v1 }
  0x2e   :  { %1715 = vmatpush3.bf16.msra.mxu1 %v2181_v4 }
  0x2f   :  { %1716 = vmatprep.subr.bf16.mxu1 %v2102_v1 }
  0x32   :  { %1717 = vmatpush3.bf16.msra.mxu1 %v2188_v5 }
  0x33   :  { %1718 = vmatprep.subr.bf16.mxu1 %v2102_v1 }
  0x36   :  { %1719 = vmatpush3.bf16.msra.mxu1 %v2197_v6 }
  0x37   :  { %1720 = vmatprep.subr.bf16.mxu1 %v2102_v1 }
  0x38   :  { %12 = vsyncpa [#allocation4], 0  ;;  %v2004_v11 = vld [vmem:[%s2626_s0 + $0x8] sm:$0xff]   ;;  %v2005_v12 = vld [vmem:[%s2626_s0 + $0x10] sm:$0xff]   ;;  %v2104_v33 = vmov 32  }
  0x39   :  { %v2009_v13 = vld [vmem:[%s2629_s3 + $0x40] sm:$0xff]   ;;  %v2010_v14 = vld [vmem:[%s2629_s3 + $0x48] sm:$0xff]   ;;  %v2006_v15 = vld [vmem:[%s2626_s0 + $0x18] sm:$0xff]   ;;  %1994 = vset.pattern.permute.xlu0 %v2104_v33 }
  0x3a   :  { %1721 = vmatpush3.bf16.msra.mxu1 %v2206_v7  ;;  %1809 = vmatpush3.bf16.msra.mxu0 %v2009_v13  ;;  %v2011_v16 = vld [vmem:[%s2629_s3 + $0x50] sm:$0xff]   ;;  %v2012_v17 = vld [vmem:[%s2629_s3 + $0x58] sm:$0xff]   ;;  %v2013_v18 = vld [vmem:[%s2629_s3 + $0x60] sm:$0xff]  }
  0x3b   :  { %1722 = vmatprep.subr.bf16.mxu1 %v2102_v1  ;;  %1810 = vmatprep.subr.bf16.mxu0 %v2102_v1  ;;  %v2014_v19 = vld [vmem:[%s2629_s3 + $0x68] sm:$0xff]   ;;  %v2015_v20 = vld [vmem:[%s2629_s3 + $0x70] sm:$0xff]   ;;  %v2016_v21 = vld [vmem:[%s2629_s3 + $0x78] sm:$0xff]  }
  0x3c   :  { %v2008_v22 = vld [vmem:[%s2626_s0 + $0x28] sm:$0xff]   ;;  %v2017_v38 = vld [vmem:[%s2629_s3] sm:$0xff]   ;;  %v2019_v43 = vld [vmem:[%s2629_s3 + $0x10] sm:$0xff]  }
  0x3d   :  { %v2018_v42 = vld [vmem:[%s2629_s3 + $0x8] sm:$0xff]   ;;  %v2020_v44 = vld [vmem:[%s2629_s3 + $0x18] sm:$0xff]   ;;  %v2021_v45 = vld [vmem:[%s2629_s3 + $0x20] sm:$0xff]  }
  0x3e   :  { %1723 = vmatpush3.bf16.msra.mxu1 %v2215_v8  ;;  %1811 = vmatpush3.bf16.msra.mxu0 %v2010_v14  ;;  %v2022_v46 = vld [vmem:[%s2629_s3 + $0x28] sm:$0xff]   ;;  %v2023_v47 = vld [vmem:[%s2629_s3 + $0x30] sm:$0xff]   ;;  %v2024_v48 = vld [vmem:[%s2629_s3 + $0x38] sm:$0xff]  }
  0x3f   :  { %1728 = vmatprep.subr.bf16.mxu1 %v2102_v1  ;;  %1812 = vmatprep.subr.bf16.mxu0 %v2102_v1  ;;  %v2025_v53 = vld [vmem:[%s2629_s3 + $0x80] sm:$0xff]   ;;  %v2026_v57 = vld [vmem:[%s2629_s3 + $0x88] sm:$0xff]   ;;  %v2027_v58 = vld [vmem:[%s2629_s3 + $0x90] sm:$0xff]  }
  0x40   :  { %v2028_v59 = vld [vmem:[%s2629_s3 + $0x98] sm:$0xff]   ;;  %v2029_v60 = vld [vmem:[%s2629_s3 + $0xa0] sm:$0xff]   ;;  %v2030_v61 = vld [vmem:[%s2629_s3 + $0xa8] sm:$0xff]  }
  0x41   :  { %1725 = vmatmul.mubr.bf16.vlgmr.msra.gmra.mrb[4].mxu1 %v2004_v11  ;;  %v2031_v62 = vld [vmem:[%s2629_s3 + $0xb0] sm:$0xff]   ;;  %v2032_v63 = vld [vmem:[%s2629_s3 + $0xb8] sm:$0xff]   ;;  %v2034_v11 = vld [vmem:[%s2629_s3 + $0xc8] sm:$0xff]  }
  0x42   :  { %1729 = vmatpush3.bf16.msra.mxu1 %v2151_v0  ;;  %1744 = vmatprep.mubr.msk.bf16.mxu1 %vm2103_vm0, %v2102_v1  ;;  %v2036_v13 = vld [vmem:[%s2629_s3 + $0xd8] sm:$0xff]   ;;  %v2037_v14 = vld [vmem:[%s2629_s3 + $0xe0] sm:$0xff]  }
  0x43   :  { %1730 = vmatprep.subr.bf16.mxu1 %v2102_v1  ;;  %1813 = vmatpush3.bf16.msra.mxu0 %v2011_v16  ;;  %v2039_v16 = vld [vmem:[%s2629_s3 + $0xf0] sm:$0xff]   ;;  %v2044_v33 = vld [vmem:[%s2629_s3 + $0x118] sm:$0xff]  }
  0x44   :  { %1814 = vmatprep.subr.bf16.mxu0 %v2102_v1 }
  0x46   :  { %1731 = vmatpush3.bf16.msra.mxu1 %v2159_v2 }
  0x47   :  { %1732 = vmatprep.subr.bf16.mxu1 %v2102_v1  ;;  %1815 = vmatpush3.bf16.msra.mxu0 %v2012_v17  ;;  %v2040_v17 = vld [vmem:[%s2629_s3 + $0xf8] sm:$0xff]  }
  0x48   :  { %1816 = vmatprep.subr.bf16.mxu0 %v2102_v1 }
  0x4a   :  { %1733 = vmatpush3.bf16.msra.mxu1 %v2172_v3 }
  0x4b   :  { %1734 = vmatprep.subr.bf16.mxu1 %v2102_v1  ;;  %1817 = vmatpush3.bf16.msra.mxu0 %v2013_v18 }
  0x4c   :  { %1818 = vmatprep.subr.bf16.mxu0 %v2102_v1 }
  0x4e   :  { %1735 = vmatpush3.bf16.msra.mxu1 %v2181_v4 }
  0x4f   :  { %1736 = vmatprep.subr.bf16.mxu1 %v2102_v1  ;;  %1819 = vmatpush3.bf16.msra.mxu0 %v2014_v19 }
  0x50   :  { %1820 = vmatprep.subr.bf16.mxu0 %v2102_v1 }
  0x52   :  { %1737 = vmatpush3.bf16.msra.mxu1 %v2188_v5 }
  0x53   :  { %1738 = vmatprep.subr.bf16.mxu1 %v2102_v1  ;;  %1821 = vmatpush3.bf16.msra.mxu0 %v2015_v20 }
  0x54   :  { %1822 = vmatprep.subr.bf16.mxu0 %v2102_v1 }
  0x56   :  { %1739 = vmatpush3.bf16.msra.mxu1 %v2197_v6 }
  0x57   :  { %1740 = vmatprep.subr.bf16.mxu1 %v2102_v1  ;;  %1823 = vmatpush3.bf16.msra.mxu0 %v2016_v21 }
  0x58   :  { %1828 = vmatprep.subr.bf16.mxu0 %v2102_v1 }
  0x5a   :  { %1741 = vmatpush3.bf16.msra.mxu1 %v2206_v7 }
  0x5b   :  { %1742 = vmatprep.subr.bf16.mxu1 %v2102_v1 }
  0x5e   :  { %1743 = vmatpush3.bf16.msra.mxu1 %v2215_v8 }
  0x5f   :  { %1748 = vmatprep.subr.bf16.mxu1 %v2102_v1 }
  0x61   :  { %1745 = vmatmul.mubr.bf16.vlgmr.msra.gmra.mrb[8].mxu1 %v2005_v12  ;;  %v2035_v12 = vld [vmem:[%s2629_s3 + $0xd0] sm:$0xff]  }
  0x62   :  { %1749 = vmatpush3.bf16.msra.mxu1 %v2151_v0  ;;  %1764 = vmatprep.mubr.msk.bf16.mxu1 %vm2103_vm0, %v2102_v1 }
  0x63   :  { %1750 = vmatprep.subr.bf16.mxu1 %v2102_v1 }
  0x66   :  { %1751 = vmatpush3.bf16.msra.mxu1 %v2159_v2 }
  0x67   :  { %1752 = vmatprep.subr.bf16.mxu1 %v2102_v1 }
  0x6a   :  { %1753 = vmatpush3.bf16.msra.mxu1 %v2172_v3 }
  0x6b   :  { %1754 = vmatprep.subr.bf16.mxu1 %v2102_v1 }
  0x6e   :  { %1755 = vmatpush3.bf16.msra.mxu1 %v2181_v4 }
  0x6f   :  { %1756 = vmatprep.subr.bf16.mxu1 %v2102_v1 }
  0x72   :  { %1757 = vmatpush3.bf16.msra.mxu1 %v2188_v5 }
  0x73   :  { %1758 = vmatprep.subr.bf16.mxu1 %v2102_v1 }
  0x76   :  { %1759 = vmatpush3.bf16.msra.mxu1 %v2197_v6 }
  0x77   :  { %1760 = vmatprep.subr.bf16.mxu1 %v2102_v1 }
  0x7a   :  { %1761 = vmatpush3.bf16.msra.mxu1 %v2206_v7 }
  0x7b   :  { %1762 = vmatprep.subr.bf16.mxu1 %v2102_v1 }
  0x7e   :  { %1763 = vmatpush3.bf16.msra.mxu1 %v2215_v8 }
  0x7f   :  { %1788 = vmatprep.subr.bf16.mxu1 %v2102_v1 }
  0x81   :  { %1765 = vmatmul.mubr.bf16.vlgmr.msra.gmra.mrb[12].mxu1 %v2006_v15  ;;  %v2038_v15 = vld [vmem:[%s2629_s3 + $0xe8] sm:$0xff]  }
  0x82   :  { %1789 = vmatpush3.bf16.msra.mxu1 %v2151_v0  ;;  %1804 = vmatprep.mubr.msk.bf16.mxu1 %vm2103_vm0, %v2102_v1 }
  0x83   :  { %1790 = vmatprep.subr.bf16.mxu1 %v2102_v1 }
  0x86   :  { %1791 = vmatpush3.bf16.msra.mxu1 %v2159_v2 }
  0x87   :  { %1792 = vmatprep.subr.bf16.mxu1 %v2102_v1 }
  0x8a   :  { %1793 = vmatpush3.bf16.msra.mxu1 %v2172_v3 }
  0x8b   :  { %1794 = vmatprep.subr.bf16.mxu1 %v2102_v1 }
  0x8e   :  { %1795 = vmatpush3.bf16.msra.mxu1 %v2181_v4 }
  0x8f   :  { %1796 = vmatprep.subr.bf16.mxu1 %v2102_v1 }
  0x92   :  { %1797 = vmatpush3.bf16.msra.mxu1 %v2188_v5  ;;  %v2033_v5 = vld [vmem:[%s2629_s3 + $0xc0] sm:$0xff]  }
  0x93   :  { %1798 = vmatprep.subr.bf16.mxu1 %v2102_v1 }
  0x96   :  { %1799 = vmatpush3.bf16.msra.mxu1 %v2197_v6 }
  0x97   :  { %1800 = vmatprep.subr.bf16.mxu1 %v2102_v1 }
  0x9a   :  { %1801 = vmatpush3.bf16.msra.mxu1 %v2206_v7 }
  0x9b   :  { %1802 = vmatprep.subr.bf16.mxu1 %v2102_v1 }
  0x9e   :  { %1803 = vmatpush3.bf16.msra.mxu1 %v2215_v8 }
  0x9f   :  { %1928 = vmatprep.subr.bf16.mxu1 %v2102_v1 }
  0xa1   :  { %1805 = vmatmul.mubr.bf16.vlgmr.msra.gmra.mrb[16].mxu1 %v2008_v22  ;;  %v2041_v22 = vld [vmem:[%s2629_s3 + $0x100] sm:$0xff]  }
  0xa2   :  { %1944 = vmatprep.mubr.msk.bf16.mxu1 %vm2103_vm0, %v2102_v1 }
  0xf4   :  { %v152_v23 = vpop.f32.mrb[0].mxu1 }
  0xf5   :  { %v1706_v24 = vpop.f32.mrb[1].mxu1 }
  0xf6   :  { %v155_v25 = vpop.f32.mrb[2].mxu1  ;;  %v2352_v26 = vpop.f32.mrb[0].mxu0 }
  0xf7   :  { %v453_v27 = vpack.c.bf16 %v155_v25, %v152_v23  ;;  %v1707_v28 = vpop.f32.mrb[3].mxu1  ;;  %v1786_v29 = vpop.f32.mrb[1].mxu0 }
  0xf8   :  { %v2354_v30 = vpop.f32.mrb[2].mxu0  ;;  %v2042_v29 = vld [vmem:[%s2629_s3 + $0x108] sm:$0xff]  }
  0xf9   :  { %v900_v31 = vpack.c.bf16 %v2354_v30, %v2352_v26  ;;  %v1787_v32 = vpop.f32.mrb[3].mxu0 }
  0xfa   :  { %v2043_v32 = vld [vmem:[%s2629_s3 + $0x110] sm:$0xff]  }
 0x114   :  { %v209_v34 = vpop.f32.mrb[4].mxu1 }
 0x115   :  { %v472_v35 = vadd.f32 %v209_v34, %v152_v23  ;;  %v1726_v36 = vpop.f32.mrb[5].mxu1 }
 0x116   :  { %v212_v37 = vpop.f32.mrb[6].mxu1 }
 0x117   :  { %v473_v39 = vadd.f32 %v212_v37, %v155_v25  ;;  %v474_v40 = vpack.c.bf16 %v212_v37, %v209_v34  ;;  %v1727_v41 = vpop.f32.mrb[7].mxu1  ;;  %v2045_v37 = vld [vmem:[%s2629_s3 + $0x120] sm:$0xff]  }
 0x118   :  { %v2058_v41 = vld [vmem:[%s2631_s5 + $0x8] sm:$0xff]  }
 0x119   :  { %1825 = vmatmul.mubr.bf16.vlgmr.msra.gmra.mrb[4].mxu0 %v474_v40  ;;  %v2046_v40 = vld [vmem:[%s2629_s3 + $0x128] sm:$0xff]  }
 0x11a   :  { %1829 = vmatpush3.bf16.msra.mxu0 %v2017_v38  ;;  %1844 = vmatprep.mubr.msk.bf16.mxu0 %vm2103_vm0, %v2102_v1 }
 0x11b   :  { %1830 = vmatprep.subr.bf16.mxu0 %v2102_v1 }
 0x11e   :  { %1831 = vmatpush3.bf16.msra.mxu0 %v2018_v42  ;;  %v2047_v42 = vld [vmem:[%s2629_s3 + $0x130] sm:$0xff]  }
 0x11f   :  { %1832 = vmatprep.subr.bf16.mxu0 %v2102_v1 }
 0x122   :  { %1833 = vmatpush3.bf16.msra.mxu0 %v2019_v43  ;;  %v2059_v43 = vld [vmem:[%s2631_s5 + $0x10] sm:$0xff]  }
 0x123   :  { %1834 = vmatprep.subr.bf16.mxu0 %v2102_v1 }
 0x126   :  { %1835 = vmatpush3.bf16.msra.mxu0 %v2020_v44  ;;  %v2048_v44 = vld [vmem:[%s2629_s3 + $0x138] sm:$0xff]  }
 0x127   :  { %1836 = vmatprep.subr.bf16.mxu0 %v2102_v1 }
 0x12a   :  { %1837 = vmatpush3.bf16.msra.mxu0 %v2021_v45  ;;  %v2060_v45 = vld [vmem:[%s2631_s5 + $0x18] sm:$0xff]  }
 0x12b   :  { %1838 = vmatprep.subr.bf16.mxu0 %v2102_v1 }
 0x12e   :  { %1839 = vmatpush3.bf16.msra.mxu0 %v2022_v46  ;;  %v2049_v46 = vld [vmem:[%s2629_s3 + $0x140] sm:$0xff]  }
 0x12f   :  { %1840 = vmatprep.subr.bf16.mxu0 %v2102_v1 }
 0x132   :  { %1841 = vmatpush3.bf16.msra.mxu0 %v2023_v47  ;;  %v2061_v47 = vld [vmem:[%s2631_s5 + $0x20] sm:$0xff]  }
 0x133   :  { %1842 = vmatprep.subr.bf16.mxu0 %v2102_v1 }
 0x134   :  { %v266_v49 = vpop.f32.mrb[8].mxu1 }
 0x135   :  { %v672_v50 = vadd.f32 %v472_v35, %v266_v49  ;;  %v1746_v51 = vpop.f32.mrb[9].mxu1 }
 0x136   :  { %1843 = vmatpush3.bf16.msra.mxu0 %v2024_v48  ;;  %v269_v52 = vpop.f32.mrb[10].mxu1  ;;  %v2050_v48 = vld [vmem:[%s2629_s3 + $0x148] sm:$0xff]  }
 0x137   :  { %v673_v54 = vadd.f32 %v473_v39, %v269_v52  ;;  %v674_v55 = vpack.c.bf16 %v269_v52, %v266_v49  ;;  %1848 = vmatprep.subr.bf16.mxu0 %v2102_v1  ;;  %v1747_v56 = vpop.f32.mrb[11].mxu1  ;;  %v2057_v39 = vld [vmem:[%s2631_s5] sm:$0xff]   ;;  %v2062_v49 = vld [vmem:[%s2631_s5 + $0x28] sm:$0xff]   ;;  %v2055_v52 = vld [vmem:[%s2629_s3 + $0x170] sm:$0xff]  }
 0x138   :  { %1929 = vmatpush3.bf16.msra.mxu1 %v2057_v39  ;;  %v2054_v51 = vld [vmem:[%s2629_s3 + $0x168] sm:$0xff]  }
 0x139   :  { %1845 = vmatmul.mubr.bf16.vlgmr.msra.gmra.mrb[4].mxu0 %v453_v27  ;;  %1930 = vmatprep.subr.bf16.mxu1 %v2102_v1 }
 0x13a   :  { %1849 = vmatpush3.bf16.msra.mxu0 %v2025_v53  ;;  %1864 = vmatprep.mubr.msk.bf16.mxu0 %vm2103_vm0, %v2102_v1  ;;  %v2056_v53 = vld [vmem:[%s2629_s3 + $0x178] sm:$0xff]  }
 0x13b   :  { %1850 = vmatprep.subr.bf16.mxu0 %v2102_v1 }
 0x13c   :  { %1931 = vmatpush3.bf16.msra.mxu1 %v2058_v41 }
 0x13d   :  { %1932 = vmatprep.subr.bf16.mxu1 %v2102_v1 }
 0x13e   :  { %1851 = vmatpush3.bf16.msra.mxu0 %v2026_v57 }
 0x13f   :  { %1852 = vmatprep.subr.bf16.mxu0 %v2102_v1 }
 0x140   :  { %1933 = vmatpush3.bf16.msra.mxu1 %v2059_v43 }
 0x141   :  { %1934 = vmatprep.subr.bf16.mxu1 %v2102_v1 }
 0x142   :  { %1853 = vmatpush3.bf16.msra.mxu0 %v2027_v58 }
 0x143   :  { %1854 = vmatprep.subr.bf16.mxu0 %v2102_v1 }
 0x144   :  { %1935 = vmatpush3.bf16.msra.mxu1 %v2060_v45 }
 0x145   :  { %1936 = vmatprep.subr.bf16.mxu1 %v2102_v1 }
 0x146   :  { %1855 = vmatpush3.bf16.msra.mxu0 %v2028_v59 }
 0x147   :  { %1856 = vmatprep.subr.bf16.mxu0 %v2102_v1 }
 0x148   :  { %1937 = vmatpush3.bf16.msra.mxu1 %v2061_v47 }
 0x149   :  { %1938 = vmatprep.subr.bf16.mxu1 %v2102_v1 }
 0x14a   :  { %1857 = vmatpush3.bf16.msra.mxu0 %v2029_v60 }
 0x14b   :  { %1858 = vmatprep.subr.bf16.mxu0 %v2102_v1 }
 0x14c   :  { %1939 = vmatpush3.bf16.msra.mxu1 %v2062_v49 }
 0x14d   :  { %1940 = vmatprep.subr.bf16.mxu1 %v2102_v1 }
 0x14e   :  { %1859 = vmatpush3.bf16.msra.mxu0 %v2030_v61 }
 0x14f   :  { %1860 = vmatprep.subr.bf16.mxu0 %v2102_v1 }
 0x152   :  { %1861 = vmatpush3.bf16.msra.mxu0 %v2031_v62 }
 0x153   :  { %1862 = vmatprep.subr.bf16.mxu0 %v2102_v1 }
 0x154   :  { %v323_v0 = vpop.f32.mrb[12].mxu1 }
 0x155   :  { %v785_v2 = vadd.f32 %v672_v50, %v323_v0  ;;  %v1766_v3 = vpop.f32.mrb[13].mxu1  ;;  %v2053_v50 = vld [vmem:[%s2629_s3 + $0x160] sm:$0xff]  }
 0x156   :  { %1863 = vmatpush3.bf16.msra.mxu0 %v2032_v63  ;;  %v326_v4 = vpop.f32.mrb[14].mxu1  ;;  %v2065_v63 = vld [vmem:[%s2630_s4] sm:$0xff]   ;;  %v2067_v3 = vld [vmem:[%s2630_s4 + $0x10] sm:$0xff]  }
 0x157   :  { %v786_v6 = vadd.f32 %v673_v54, %v326_v4  ;;  %v787_v7 = vpack.c.bf16 %v326_v4, %v323_v0  ;;  %v898_v8 = vadd.f32 %v785_v2, %v2352_v26  ;;  %1868 = vmatprep.subr.bf16.mxu0 %v2102_v1  ;;  %v1767_v9 = vpop.f32.mrb[15].mxu1  ;;  %v2051_v26 = vld [vmem:[%s2629_s3 + $0x150] sm:$0xff]   ;;  %v2064_v54 = vld [vmem:[%s2631_s5 + $0x38] sm:$0xff]   ;;  %v2066_v2 = vld [vmem:[%s2630_s4 + $0x8] sm:$0xff]  }
 0x158   :  { %v2068_v4 = vld [vmem:[%s2630_s4 + $0x18] sm:$0xff]   ;;  %v2073_v9 = vld [vmem:[%s2628_s2] sm:$0xff]  }
 0x159   :  { %v899_v10 = vadd.f32 %v786_v6, %v2354_v30  ;;  %1865 = vmatmul.mubr.bf16.vlgmr.msra.gmra.mrb[4].mxu0 %v674_v55  ;;  %v2063_v30 = vld [vmem:[%s2631_s5 + $0x30] sm:$0xff]   ;;  %v2070_v6 = vld [vmem:[%s2630_s4 + $0x28] sm:$0xff]  }
 0x15a   :  { %1869 = vmatpush3.bf16.msra.mxu0 %v2033_v5  ;;  %1884 = vmatprep.mubr.msk.bf16.mxu0 %vm2103_vm0, %v2102_v1  ;;  %v2069_v5 = vld [vmem:[%s2630_s4 + $0x20] sm:$0xff]  }
 0x15b   :  { %1870 = vmatprep.subr.bf16.mxu0 %v2102_v1  ;;  %1941 = vmatpush3.bf16.msra.mxu1 %v2063_v30 }
 0x15c   :  { %1942 = vmatprep.subr.bf16.mxu1 %v2102_v1 }
 0x15e   :  { %1871 = vmatpush3.bf16.msra.mxu0 %v2034_v11 }
 0x15f   :  { %1872 = vmatprep.subr.bf16.mxu0 %v2102_v1  ;;  %1943 = vmatpush3.bf16.msra.mxu1 %v2064_v54 }
 0x160   :  { %1948 = vmatprep.subr.bf16.mxu1 %v2102_v1 }
 0x162   :  { %1873 = vmatpush3.bf16.msra.mxu0 %v2035_v12 }
 0x163   :  { %1874 = vmatprep.subr.bf16.mxu0 %v2102_v1 }
 0x166   :  { %1875 = vmatpush3.bf16.msra.mxu0 %v2036_v13 }
 0x167   :  { %1876 = vmatprep.subr.bf16.mxu0 %v2102_v1 }
 0x16a   :  { %1877 = vmatpush3.bf16.msra.mxu0 %v2037_v14 }
 0x16b   :  { %1878 = vmatprep.subr.bf16.mxu0 %v2102_v1 }
 0x16e   :  { %1879 = vmatpush3.bf16.msra.mxu0 %v2038_v15  ;;  %v1561_v15 = vld [vmem:[%s2632_s6] ss:$0 sm:$0xff] }
 0x16f   :  { %1880 = vmatprep.subr.bf16.mxu0 %v2102_v1 }
 0x172   :  { %1881 = vmatpush3.bf16.msra.mxu0 %v2039_v16 }
 0x173   :  { %1882 = vmatprep.subr.bf16.mxu0 %v2102_v1 }
 0x174   :  { %v2461_v18 = vpop.f32.mrb[16].mxu1 }
 0x175   :  { %v1011_v19 = vadd.f32 %v898_v8, %v2461_v18  ;;  %v1806_v20 = vpop.f32.mrb[17].mxu1  ;;  %v2072_v8 = vld [vmem:[%s2630_s4 + $0x38] sm:$0xff]  }
 0x176   :  { %1883 = vmatpush3.bf16.msra.mxu0 %v2040_v17  ;;  %v2464_v21 = vpop.f32.mrb[18].mxu1 }
 0x177   :  { %v1124_v23 = vmax.f32 %v1011_v19, 1.0  ;;  %v1012_v24 = vadd.f32 %v899_v10, %v2464_v21  ;;  %v1013_v25 = vpack.c.bf16 %v2464_v21, %v2461_v18  ;;  %1888 = vmatprep.subr.bf16.mxu0 %v2102_v1  ;;  %v1807_v27 = vpop.f32.mrb[19].mxu1  ;;  %vm1122_vm1 = vcmp.gt.f32.partialorder %v1011_v19, 0.5 }
 0x179   :  { %2074 = vrcp.f32 %v1124_v23  ;;  %v1125_v28 = vmax.f32 %v1012_v24, 1.0  ;;  %1885 = vmatmul.mubr.bf16.vlgmr.msra.gmra.mrb[4].mxu0 %v787_v7  ;;  %vm1123_vm2 = vcmp.gt.f32.partialorder %v1012_v24, 0.5  ;;  %v2071_v7 = vld [vmem:[%s2630_s4 + $0x30] sm:$0xff]   ;;  %s2105_s4 = smov [#allocation3]  }
 0x17a   :  { %1889 = vmatpush3.bf16.msra.mxu0 %v2041_v22  ;;  %1904 = vmatprep.mubr.msk.bf16.mxu0 %vm2103_vm0, %v2102_v1  ;;  %s1381_s10 = sshll.u32 %s2105_s4, 4  ;;  %s1382_s10 = int_to_ptr.vmem [resolvable:$true] %s1381_s10 }
 0x17b   :  { %2076 = vrcp.f32 %v1125_v28  ;;  %1890 = vmatprep.subr.bf16.mxu0 %v2102_v1  ;;  %s2078_s2 = scalar_lea.vmem %s1382_s10, 256  ;;  %p2083_p1 = scmp.lt.s32.totalorder %s1382_s10, %s1382_s10 }
 0x17c   :  { %p2079_p0 = scmp.ne.s32.totalorder %s1382_s10, %s2078_s2  ;;  %p2084_p2 = scmp.lt.s32.totalorder %s2078_s2, %s2078_s2 }
 0x17e   :  { %1891 = vmatpush3.bf16.msra.mxu0 %v2042_v29  ;;  %p2085_p3 = por %p2084_p2, %p2083_p1 }
 0x17f   :  { %1892 = vmatprep.subr.bf16.mxu0 %v2102_v1 }
 0x180   :  { %p2086_p4 = pnand %p2085_p3, %p2079_p0 }
 0x182   :  { %1893 = vmatpush3.bf16.msra.mxu0 %v2043_v32 }
 0x183   :  { %v2075_v34 = vpop.eup %2074  ;;  %1894 = vmatprep.subr.bf16.mxu0 %v2102_v1 }
 0x184   :  { %v1130_v35 = vsel %vm1122_vm1, %v2075_v34, 0.0 }
 0x185   :  { %v2077_v36 = vpop.eup %2076  ;;  %1134 = vperm.xlu0 %1994, %v1130_v35  }
 0x186   :  { %1895 = vmatpush3.bf16.msra.mxu0 %v2044_v33  ;;  %v1131_v38 = vsel %vm1123_vm2, %v2077_v36, 0.0 }
 0x187   :  { %1896 = vmatprep.subr.bf16.mxu0 %v2102_v1 }
 0x189   :  { %1139 = vperm.xlu0 %1994, %v1131_v38  }
 0x18a   :  { %1897 = vmatpush3.bf16.msra.mxu0 %v2045_v37 }
 0x18b   :  { %1898 = vmatprep.subr.bf16.mxu0 %v2102_v1 }
 0x18e   :  { %1899 = vmatpush3.bf16.msra.mxu0 %v2046_v40 }
 0x18f   :  { %1900 = vmatprep.subr.bf16.mxu0 %v2102_v1 }
 0x192   :  { %1901 = vmatpush3.bf16.msra.mxu0 %v2047_v42 }
 0x193   :  { %1902 = vmatprep.subr.bf16.mxu0 %v2102_v1 }
 0x196   :  { %1903 = vmatpush3.bf16.msra.mxu0 %v2048_v44 }
 0x197   :  { %1908 = vmatprep.subr.bf16.mxu0 %v2102_v1 }
 0x199   :  { %1905 = vmatmul.mubr.bf16.vlgmr.msra.gmra.mrb[4].mxu0 %v900_v31  ;;  %v2052_v31 = vld [vmem:[%s2629_s3 + $0x158] sm:$0xff]  }
 0x19a   :  { %1909 = vmatpush3.bf16.msra.mxu0 %v2049_v46  ;;  %1924 = vmatprep.mubr.msk.bf16.mxu0 %vm2103_vm0, %v2102_v1 }
 0x19b   :  { %1910 = vmatprep.subr.bf16.mxu0 %v2102_v1 }
 0x19e   :  { %1911 = vmatpush3.bf16.msra.mxu0 %v2050_v48 }
 0x19f   :  { %1912 = vmatprep.subr.bf16.mxu0 %v2102_v1 }
 0x1a2   :  { %1913 = vmatpush3.bf16.msra.mxu0 %v2051_v26 }
 0x1a3   :  { %1914 = vmatprep.subr.bf16.mxu0 %v2102_v1 }
 0x1a6   :  { %1915 = vmatpush3.bf16.msra.mxu0 %v2052_v31 }
 0x1a7   :  { %1916 = vmatprep.subr.bf16.mxu0 %v2102_v1 }
 0x1aa   :  { %1917 = vmatpush3.bf16.msra.mxu0 %v2053_v50 }
 0x1ab   :  { %1918 = vmatprep.subr.bf16.mxu0 %v2102_v1 }
 0x1ae   :  { %1919 = vmatpush3.bf16.msra.mxu0 %v2054_v51 }
 0x1af   :  { %1920 = vmatprep.subr.bf16.mxu0 %v2102_v1 }
 0x1b2   :  { %1921 = vmatpush3.bf16.msra.mxu0 %v2055_v52 }
 0x1b3   :  { %1922 = vmatprep.subr.bf16.mxu0 %v2102_v1 }
 0x1b6   :  { %1923 = vmatpush3.bf16.msra.mxu0 %v2056_v53 }
 0x1b9   :  { %1925 = vmatmul.mubr.bf16.vlgmr.msra.gmra.mrb[4].mxu0 %v1013_v25 }
 0x204   :  { %v1135_v55 = vpop.permute.xlu0 %1134 }
 0x208   :  { %v1140_v58 = vpop.permute.xlu0 %1139 }
 0x28c   :  { %v1113_v56 = vpop.f32.mrb[4].mxu0 }
 0x28d   :  { %v1926_v57 = vpop.f32.mrb[5].mxu0  ;;  %v1142_v60 = vmul.f32 %v1135_v55, %v1113_v56 }
 0x28e   :  { %v1116_v59 = vpop.f32.mrb[6].mxu0 }
 0x28f   :  { %v1143_v61 = vmul.f32 %v1140_v58, %v1116_v59  ;;  %v1927_v62 = vpop.f32.mrb[7].mxu0 }
 0x291   :  { %v1144_v0 = vpack.c.bf16 %v1143_v61, %v1142_v60 }
 0x293   :  { %1945 = vmatmul.mubr.bf16.vlgmr.msra.gmra.mrb[20].mxu1 %v1144_v0 }
 0x294   :  { %1949 = vmatpush3.bf16.msra.mxu1 %v2065_v63  ;;  %1964 = vmatprep.mubr.msk.bf16.mxu1 %vm2103_vm0, %v2102_v1 }
 0x295   :  { %1950 = vmatprep.subr.bf16.mxu1 %v2102_v1 }
 0x298   :  { %1951 = vmatpush3.bf16.msra.mxu1 %v2066_v2 }
 0x299   :  { %1952 = vmatprep.subr.bf16.mxu1 %v2102_v1 }
 0x29c   :  { %1953 = vmatpush3.bf16.msra.mxu1 %v2067_v3 }
 0x29d   :  { %1954 = vmatprep.subr.bf16.mxu1 %v2102_v1 }
 0x2a0   :  { %1955 = vmatpush3.bf16.msra.mxu1 %v2068_v4 }
 0x2a1   :  { %1956 = vmatprep.subr.bf16.mxu1 %v2102_v1 }
 0x2a4   :  { %1957 = vmatpush3.bf16.msra.mxu1 %v2069_v5 }
 0x2a5   :  { %1958 = vmatprep.subr.bf16.mxu1 %v2102_v1 }
 0x2a8   :  { %1959 = vmatpush3.bf16.msra.mxu1 %v2070_v6 }
 0x2a9   :  { %1960 = vmatprep.subr.bf16.mxu1 %v2102_v1 }
 0x2ac   :  { %1961 = vmatpush3.bf16.msra.mxu1 %v2071_v7 }
 0x2ad   :  { %1962 = vmatprep.subr.bf16.mxu1 %v2102_v1 }
 0x2b0   :  { %1963 = vmatpush3.bf16.msra.mxu1 %v2072_v8 }
 0x2b3   :  { %1965 = vmatmul.mubr.bf16.vlgmr.msra.gmra.mrb[24].mxu1 %v2073_v9 }
 0x366   :  { %v1261_v10 = vpop.f32.mrb[20].mxu1 }
 0x367   :  { %v1946_v11 = vpop.f32.mrb[21].mxu1 }
 0x368   :  { %v1264_v12 = vpop.f32.mrb[22].mxu1 }
 0x369   :  { %v1947_v13 = vpop.f32.mrb[23].mxu1 }
 0x386   :  { %v1356_v14 = vpop.f32.mrb[24].mxu1 }
 0x387   :  { %v1357_v16 = vadd.f32 %v1356_v14, %v1261_v10  ;;  %v1966_v17 = vpop.f32.mrb[25].mxu1 }
 0x388   :  { %v1359_v18 = vpop.f32.mrb[26].mxu1 }
 0x389   :  { %v1370_v19 = vadd.f32 %v1561_v15, %v1357_v16  ;;  %v1360_v1 = vadd.f32 %v1359_v18, %v1264_v12  ;;  %v1967_v20 = vpop.f32.mrb[27].mxu1 }
 0x38b   :  { %v1372_v21 = vmax.f32 %v1370_v19, 0.0  ;;  %v1371_v22 = vadd.f32 %v1561_v15, %v1360_v1 }
 0x38d   :  { %1374 = vst [vmem:[#allocation3] sm:$0xff] %v1372_v21  ;;  %v1373_v23 = vmax.f32 %v1371_v22, 0.0 }
 0x38f   :  { %1375 = vst [vmem:[#allocation3 + $0x8] sm:$0xff] %v1373_v23 }
 0x390   :  { %2089 = shalt.err (!%p2086_p4)
}
 0x391   :  { %s2090_s12 = scalar_lea.hbm %s2633_s7, 256 }
 0x392   :  { %p2091_p5 = scmp.ne.s32.totalorder %s2633_s7, %s2090_s12  ;;  %p2094_p6 = scmp.lt.u32.totalorder %s2090_s12, %s2633_s7 }
 0x394   :  { %p2096_p7 = pnand %p2094_p6, %p2091_p5 }
 0x396   :  { %2099 = shalt.err (!%p2096_p7)
}
 0x397   :  { %s2106_s3 = smov 128   ;;  %s2107_s17 = smov 8  }
 0x398   :  { %1387 = dma.vmem_to_hbm [thread:$0]  %s1382_s10, 256, %s2633_s7, [#allocation4], %s2106_s3, %s2106_s3, %s2107_s17  }
 0x399   :  { %2100 = dma.done.wait [#allocation4], 256  }
 0x39a   :  { %2101 = vsyncadd [#allocation4], 4294967040 }
 0x39b   :  { %1391 = vsyncpa [#allocation4], 1 }

</bundles_post_ra>
